<compile_context>
chip_gen: v7x
topology: tpu7x:2x2x1
jax: 0.10.0
libtpu: 0.0.40
codegen_flags: <defaults>
</compile_context>

<pallas_src>
import jax
import jax.numpy as jnp
from jax.experimental import pallas as pl
from jax.experimental.pallas import tpu as pltpu


def _gelu(x):
    # tanh-approximate GELU (tanh runs on the EUP slot; co-issues with VPU/MXU).
    c = 0.7978845608028654  # sqrt(2/pi)
    return 0.5 * x * (1.0 + jnp.tanh(c * x * (1.0 + 0.044715 * x * x)))


def _make_mbconv_kernel(chid: int, h_img: int):
    """Builds the kernel for a given hidden-channel count and image height."""

    def kernel(x_ref, w1_ref, b1_ref, wdw_ref, b2_ref, w3_ref, b3_ref, o_ref):
        # x_ref  : (rows, W*Cin)    rows = NB*H, lane index inside a row = w*Cin + c
        # w1_ref : (W*Cin, W*Chid)  W-block-diagonal conv1 weight, BN1 scale folded
        # b1_ref : (1, W*Chid)      BN1 bias tiled over W
        # wdw_ref: (9, W*Chid)      depthwise taps tiled over W, BN2 folded,
        #                           W-edge (wrap) taps pre-zeroed
        # b2_ref : (1, W*Chid)
        # w3_ref : (W*Chid, W*Cout) W-block-diagonal conv3 weight, BN3 folded
        # b3_ref : (1, W*Cout)
        # o_ref  : (rows, W*Cout)
        rows, _ = x_ref.shape
        lchid = w1_ref.shape[1]
        nb = rows // h_img

        x = x_ref[...]                      # f32; also reused for the residual
        w1 = w1_ref[...]
        w3 = w3_ref[...]

        # ---- conv1 (1x1, BN folded) + bias + GELU: one lane-dense MXU matmul
        h = jnp.dot(x.astype(w1.dtype), w1, preferred_element_type=jnp.float32)
        h = _gelu(h + b1_ref[...])          # (rows, W*Chid), f32

        # ---- conv2: 3x3 depthwise (BN folded), padding = 1 ------------------
        # W-direction neighbours via lane rolls (XLU).  Wrapped columns are
        # multiplied by zeros pre-folded into wdw_ref -> no lane mask needed.
        h_l = pltpu.roll(h, shift=chid, axis=1)           # value of column w-1
        h_r = pltpu.roll(h, shift=lchid - chid, axis=1)   # value of column w+1

        wdw = wdw_ref[...]
        # Row-partial sums of the three column taps for each kernel row.
        r_top = h_l * wdw[0:1] + h * wdw[1:2] + h_r * wdw[2:3]   # from row h-1
        r_mid = h_l * wdw[3:4] + h * wdw[4:5] + h_r * wdw[5:6] + b2_ref[...]
        r_bot = h_l * wdw[6:7] + h * wdw[7:8] + h_r * wdw[8:9]   # from row h+1

        # H-direction: sublane rolls by +-1 row; image-boundary rows masked via
        # an iota row index (also zeroes the cross-sample wrap when NB > 1).
        row = jax.lax.broadcasted_iota(jnp.int32, (nb, h_img, lchid), 1)
        row = row.reshape(rows, lchid)
        acc = r_mid
        acc = acc + jnp.where(row > 0, pltpu.roll(r_top, shift=1, axis=0), 0.0)
        acc = acc + jnp.where(row < h_img - 1,
                              pltpu.roll(r_bot, shift=rows - 1, axis=0), 0.0)
        acc = _gelu(acc)

        # ---- conv3 (1x1, BN folded) + bias + residual + GELU ----------------
        y = jnp.dot(acc.astype(w3.dtype), w3, preferred_element_type=jnp.float32)
        o_ref[...] = _gelu(y + b3_ref[...] + x)           # requires Cin == Cout

    return kernel


def mbconv_forward(x_nchw, params, *, mxu_dtype=jnp.float32, batch_block=None):
    """MBConv forward.  NCHW in / NCHW out (PyTorch convention).

    mxu_dtype=jnp.bfloat16 casts only the 1x1-conv matmul operands (f32
    accumulate) -> ~4x MXU + half weight DMA on v6e/v7x while the elementwise
    path stays f32 (safe on v5e, which has no bf16 VPU/EUP).
    """
    w1, b1, wdw, b2, w3, b3 = params
    N, Cin, H, W = x_nchw.shape
    Chid = w1.shape[1]
    Cout = w3.shape[1]
    assert Cin == Cout, "MBConv residual requires in_chans == out_chans"

    # Lane-pack: NCHW -> (N*H, W*C); lane index inside a row is w*C + c.
    x = jnp.transpose(x_nchw, (0, 2, 3, 1)).astype(jnp.float32)
    x = x.reshape(N * H, W * Cin)

    # ---- fold the W axis into the weights (one-time, host side) ------------
    # Block-diagonal 1x1 conv:  Wp[w*Ci + c, u*Co + d] = delta(w,u) * W[c, d].
    eye_w = jnp.eye(W, dtype=jnp.float32)
    w1p = jnp.einsum('wu,cd->wcud', eye_w, w1).reshape(W * Cin, W * Chid)
    w3p = jnp.einsum('wu,cd->wcud', eye_w, w3).reshape(W * Chid, W * Cout)
    w1p = w1p.astype(mxu_dtype)
    w3p = w3p.astype(mxu_dtype)
    b1p = jnp.tile(b1, (1, W))
    b2p = jnp.tile(b2, (1, W))
    b3p = jnp.tile(b3, (1, W))

    # Depthwise taps tiled over W; zero the left-neighbour taps at w==0 and the
    # right-neighbour taps at w==W-1 so the kernel needs no lane masks.
    wdwp = jnp.tile(wdw, (1, W))                               # (9, W*Chid)
    lane = jnp.arange(W * Chid)[None, :]
    kx = (jnp.arange(9) % 3)[:, None]
    wdwp = jnp.where((kx == 0) & (lane < Chid), 0.0, wdwp)
    wdwp = jnp.where((kx == 2) & (lane >= (W - 1) * Chid), 0.0, wdwp)

    # ---- batch blocking: whole image per step, as many samples as fit ------
    # Live set ~ 8 hidden-slab copies + double-buffered I/O blocks; the 24 MiB
    # target keeps comfortable headroom against v7x's 64 MiB VMEM.
    hidden_bytes = H * W * Chid * 4
    if batch_block is None:
        budget = 24 * 1024 * 1024
        nb = 1
        for cand in range(N, 0, -1):
            if N % cand:
                continue
            if 8 * cand * hidden_bytes > budget:
                continue
            if (cand * H) % 8 and cand != N:   # keep the block sublane-aligned
                continue
            nb = cand
            break
    else:
        nb = batch_block
    rows = nb * H

    kernel = _make_mbconv_kernel(Chid, H)
    const = lambda n: (0, 0)   # weights/biases resident across grid steps

    out = pl.pallas_call(
        kernel,
        out_shape=jax.ShapeDtypeStruct((N * H, W * Cout), jnp.float32),
        grid=(N // nb,),
        in_specs=[
            pl.BlockSpec((rows, W * Cin), lambda n: (n, 0)),
            pl.BlockSpec((W * Cin, W * Chid), const),
            pl.BlockSpec((1, W * Chid), const),
            pl.BlockSpec((9, W * Chid), const),
            pl.BlockSpec((1, W * Chid), const),
            pl.BlockSpec((W * Chid, W * Cout), const),
            pl.BlockSpec((1, W * Cout), const),
        ],
        out_specs=pl.BlockSpec((rows, W * Cout), lambda n: (n, 0)),
        compiler_params=pltpu.CompilerParams(
            dimension_semantics=("parallel",),      # megacore over batch on v7x
            vmem_limit_bytes=48 * 1024 * 1024,      # headroom under v7x 64 MiB
        ),
    )(x, w1p, b1p, wdwp, b2p, w3p, b3p)

    out = out.reshape(N, H, W, Cout)
    return jnp.transpose(out, (0, 3, 1, 2))         # NHWC -> NCHW


def make_params(key, in_chans, out_chans, expand_ratio):
    """Deterministic synthetic parameters; BN folded and scales pre-multiplied
    into the conv weights (wrapper-side, one-time)."""
    hidden = int(in_chans * expand_ratio)
    ks = jax.random.split(key, 12)

    w1_t = 0.1 * jax.random.normal(ks[0], (hidden, in_chans, 1, 1), jnp.float32)
    wdw_t = 0.1 * jax.random.normal(ks[1], (hidden, 1, 3, 3), jnp.float32)
    w3_t = 0.1 * jax.random.normal(ks[2], (out_chans, hidden, 1, 1), jnp.float32)

    def bn_fold(kg, kb, km, kv, c):
        gamma = 1.0 + 0.1 * jax.random.normal(kg, (c,), jnp.float32)
        beta = 0.1 * jax.random.normal(kb, (c,), jnp.float32)
        mean = 0.1 * jax.random.normal(km, (c,), jnp.float32)
        var = 0.5 + jnp.abs(jax.random.normal(kv, (c,), jnp.float32))
        scale = gamma / jnp.sqrt(var + 1e-5)
        bias = beta - mean * scale
        return scale, bias

    s1, bias1 = bn_fold(ks[3], ks[4], ks[5], ks[6], hidden)
    s2, bias2 = bn_fold(ks[7], ks[8], ks[9], ks[10], hidden)
    s3, bias3 = bn_fold(ks[11], ks[3], ks[7], ks[0], out_chans)

    # Channel-layout kernel params with the BN scale folded into the weights.
    w1s = jnp.transpose(w1_t[:, :, 0, 0], (1, 0)) * s1[None, :]             # (Cin, Chid)
    wdws = (jnp.transpose(wdw_t[:, 0, :, :], (1, 2, 0)).reshape(9, hidden)
            * s2[None, :])                                                  # (9, Chid)
    w3s = jnp.transpose(w3_t[:, :, 0, 0], (1, 0)) * s3[None, :]             # (Chid, Cout)

    return (w1s, bias1.reshape(1, hidden), wdws, bias2.reshape(1, hidden),
            w3s, bias3.reshape(1, out_chans))


def mbconv_reference(x_nchw, params):
    """Pure-JAX reference (same folded params, same tanh-GELU), pad-based conv."""
    w1, b1, wdw, b2, w3, b3 = params
    x = jnp.transpose(x_nchw, (0, 2, 3, 1)).astype(jnp.float32)
    N, H, W, _ = x.shape
    hi = jax.lax.Precision.HIGHEST
    h = _gelu(jnp.einsum('nhwc,cd->nhwd', x, w1, precision=hi) + b1[0])
    hp = jnp.pad(h, ((0, 0), (1, 1), (1, 1), (0, 0)))
    acc = jnp.zeros_like(h)
    for ky in range(3):
        for kx in range(3):
            acc = acc + hp[:, ky:ky + H, kx:kx + W, :] * wdw[ky * 3 + kx]
    acc = _gelu(acc + b2[0])
    y = jnp.einsum('nhwd,de->nhwe', acc, w3, precision=hi) + b3[0]
    y = _gelu(y + x)
    return jnp.transpose(y, (0, 3, 1, 2))


if __name__ == "__main__":
    key = jax.random.PRNGKey(0)
    kx, kp = jax.random.split(key)

    # MBConv(in_chans=8, out_chans=8, expand_ratio=4.0, activation=GELU, drop_path=0.0)
    B, C, Hs, Ws = 2, 8, 16, 16
    x = jax.random.normal(kx, (B, C, Hs, Ws), jnp.float32)   # NCHW like PyTorch
    params = make_params(kp, in_chans=C, out_chans=C, expand_ratio=4.0)

    y_ref = mbconv_reference(x, params)

    # f32 path (safe on all generations).
    y = mbconv_forward(x, params)
    jax.block_until_ready(y)
    assert y.shape == (B, C, Hs, Ws) and y.dtype == jnp.float32
    err = float(jnp.max(jnp.abs(y - y_ref)))
    assert err < 5e-3, f"f32 kernel mismatch vs reference: max abs err {err}"

    # bf16 MXU-operand path (v6e/v7x fast path; f32 accumulate + f32 elementwise).
    y_bf = mbconv_forward(x, params, mxu_dtype=jnp.bfloat16)
    jax.block_until_ready(y_bf)
    err_bf = float(jnp.max(jnp.abs(y_bf - y_ref)))
    assert err_bf < 5e-2, f"bf16-MXU kernel mismatch vs reference: max abs err {err_bf}"

    print("KERNEL_OK")
</pallas_src>

<mosaic_0001>
module attributes {stable_mosaic.version = 11 : i64} {
  func.func @kernel(%arg0: i32, %arg1: memref<32x128xf32, #tpu.memory_space<vmem>>, %arg2: memref<128x512xf32, #tpu.memory_space<vmem>>, %arg3: memref<1x512xf32, #tpu.memory_space<vmem>>, %arg4: memref<9x512xf32, #tpu.memory_space<vmem>>, %arg5: memref<1x512xf32, #tpu.memory_space<vmem>>, %arg6: memref<512x128xf32, #tpu.memory_space<vmem>>, %arg7: memref<1x128xf32, #tpu.memory_space<vmem>>, %arg8: memref<32x128xf32, #tpu.memory_space<vmem>>) attributes {dimension_semantics = [#tpu.dimension_semantics<parallel>], iteration_bounds = array<i64: 1>, scalar_prefetch = 0 : i64, scratch_operands = 0 : i64, tpu.core_type = #tpu.core_type<tc>, window_params = [{transform_indices = @transform_0, window_bounds = array<i64: 32, 128>}, {pipeline_mode = #tpu.pipeline_mode<synchronous>, transform_indices = @transform_1, window_bounds = array<i64: 128, 512>}, {pipeline_mode = #tpu.pipeline_mode<synchronous>, transform_indices = @transform_2, window_bounds = array<i64: 1, 512>}, {pipeline_mode = #tpu.pipeline_mode<synchronous>, transform_indices = @transform_3, window_bounds = array<i64: 9, 512>}, {pipeline_mode = #tpu.pipeline_mode<synchronous>, transform_indices = @transform_4, window_bounds = array<i64: 1, 512>}, {pipeline_mode = #tpu.pipeline_mode<synchronous>, transform_indices = @transform_5, window_bounds = array<i64: 512, 128>}, {pipeline_mode = #tpu.pipeline_mode<synchronous>, transform_indices = @transform_6, window_bounds = array<i64: 1, 128>}, {transform_indices = @transform_7, window_bounds = array<i64: 32, 128>}]} {
    %c0 = arith.constant 0 : index
    %c0_0 = arith.constant 0 : index
    %0 = vector.load %arg1[%c0, %c0_0] : memref<32x128xf32, #tpu.memory_space<vmem>>, vector<32x128xf32>
    %c0_1 = arith.constant 0 : index
    %c0_2 = arith.constant 0 : index
    %1 = vector.load %arg2[%c0_1, %c0_2] : memref<128x512xf32, #tpu.memory_space<vmem>>, vector<128x512xf32>
    %c0_3 = arith.constant 0 : index
    %c0_4 = arith.constant 0 : index
    %2 = vector.load %arg6[%c0_3, %c0_4] : memref<512x128xf32, #tpu.memory_space<vmem>>, vector<512x128xf32>
    %cst = arith.constant dense<0.000000e+00> : vector<32x512xf32>
    %3 = tpu.matmul %0, %1, %cst {dimension_numbers = #tpu.dot_dimension_numbers<[1], [0], [0], [1], [0, 0, 1, 1], [], []>} : vector<32x128xf32>, vector<128x512xf32>, vector<32x512xf32> -> vector<32x512xf32>
    %c0_5 = arith.constant 0 : index
    %c0_6 = arith.constant 0 : index
    %4 = vector.load %arg3[%c0_5, %c0_6] : memref<1x512xf32, #tpu.memory_space<vmem>>, vector<1x512xf32>
    %5 = vector.broadcast %4 : vector<1x512xf32> to vector<32x512xf32>
    %6 = arith.addf %3, %5 : vector<32x512xf32>
    %cst_7 = arith.constant 5.000000e-01 : f32
    %7 = vector.broadcast %cst_7 : f32 to vector<32x512xf32>
    %8 = arith.mulf %7, %6 : vector<32x512xf32>
    %cst_8 = arith.constant 0.797884583 : f32
    %9 = vector.broadcast %cst_8 : f32 to vector<32x512xf32>
    %10 = arith.mulf %9, %6 : vector<32x512xf32>
    %cst_9 = arith.constant 4.471500e-02 : f32
    %11 = vector.broadcast %cst_9 : f32 to vector<32x512xf32>
    %12 = arith.mulf %11, %6 : vector<32x512xf32>
    %13 = arith.mulf %12, %6 : vector<32x512xf32>
    %cst_10 = arith.constant 1.000000e+00 : f32
    %14 = vector.broadcast %cst_10 : f32 to vector<32x512xf32>
    %15 = arith.addf %14, %13 : vector<32x512xf32>
    %16 = arith.mulf %10, %15 : vector<32x512xf32>
    %17 = math.tanh %16 : vector<32x512xf32>
    %cst_11 = arith.constant 1.000000e+00 : f32
    %18 = vector.broadcast %cst_11 : f32 to vector<32x512xf32>
    %19 = arith.addf %18, %17 : vector<32x512xf32>
    %20 = arith.mulf %8, %19 : vector<32x512xf32>
    %c32_i32 = arith.constant 32 : i32
    %21 = tpu.dynamic_rotate %20 by %c32_i32 dim 1 : vector<32x512xf32>, i32 -> vector<32x512xf32>
    %c480_i32 = arith.constant 480 : i32
    %22 = tpu.dynamic_rotate %20 by %c480_i32 dim 1 : vector<32x512xf32>, i32 -> vector<32x512xf32>
    %c0_12 = arith.constant 0 : index
    %c0_13 = arith.constant 0 : index
    %23 = vector.load %arg4[%c0_12, %c0_13] : memref<9x512xf32, #tpu.memory_space<vmem>>, vector<9x512xf32>
    %24 = vector.extract_strided_slice %23 {offsets = [0, 0], sizes = [1, 512], strides = [1, 1]} : vector<9x512xf32> to vector<1x512xf32>
    %25 = vector.broadcast %24 : vector<1x512xf32> to vector<32x512xf32>
    %26 = arith.mulf %21, %25 : vector<32x512xf32>
    %27 = vector.extract_strided_slice %23 {offsets = [1, 0], sizes = [1, 512], strides = [1, 1]} : vector<9x512xf32> to vector<1x512xf32>
    %28 = vector.broadcast %27 : vector<1x512xf32> to vector<32x512xf32>
    %29 = arith.mulf %20, %28 : vector<32x512xf32>
    %30 = arith.addf %26, %29 : vector<32x512xf32>
    %31 = vector.extract_strided_slice %23 {offsets = [2, 0], sizes = [1, 512], strides = [1, 1]} : vector<9x512xf32> to vector<1x512xf32>
    %32 = vector.broadcast %31 : vector<1x512xf32> to vector<32x512xf32>
    %33 = arith.mulf %22, %32 : vector<32x512xf32>
    %34 = arith.addf %30, %33 : vector<32x512xf32>
    %35 = vector.extract_strided_slice %23 {offsets = [3, 0], sizes = [1, 512], strides = [1, 1]} : vector<9x512xf32> to vector<1x512xf32>
    %36 = vector.broadcast %35 : vector<1x512xf32> to vector<32x512xf32>
    %37 = arith.mulf %21, %36 : vector<32x512xf32>
    %38 = vector.extract_strided_slice %23 {offsets = [4, 0], sizes = [1, 512], strides = [1, 1]} : vector<9x512xf32> to vector<1x512xf32>
    %39 = vector.broadcast %38 : vector<1x512xf32> to vector<32x512xf32>
    %40 = arith.mulf %20, %39 : vector<32x512xf32>
    %41 = arith.addf %37, %40 : vector<32x512xf32>
    %42 = vector.extract_strided_slice %23 {offsets = [5, 0], sizes = [1, 512], strides = [1, 1]} : vector<9x512xf32> to vector<1x512xf32>
    %43 = vector.broadcast %42 : vector<1x512xf32> to vector<32x512xf32>
    %44 = arith.mulf %22, %43 : vector<32x512xf32>
    %45 = arith.addf %41, %44 : vector<32x512xf32>
    %c0_14 = arith.constant 0 : index
    %c0_15 = arith.constant 0 : index
    %46 = vector.load %arg5[%c0_14, %c0_15] : memref<1x512xf32, #tpu.memory_space<vmem>>, vector<1x512xf32>
    %47 = vector.broadcast %46 : vector<1x512xf32> to vector<32x512xf32>
    %48 = arith.addf %45, %47 : vector<32x512xf32>
    %49 = vector.extract_strided_slice %23 {offsets = [6, 0], sizes = [1, 512], strides = [1, 1]} : vector<9x512xf32> to vector<1x512xf32>
    %50 = vector.broadcast %49 : vector<1x512xf32> to vector<32x512xf32>
    %51 = arith.mulf %21, %50 : vector<32x512xf32>
    %52 = vector.extract_strided_slice %23 {offsets = [7, 0], sizes = [1, 512], strides = [1, 1]} : vector<9x512xf32> to vector<1x512xf32>
    %53 = vector.broadcast %52 : vector<1x512xf32> to vector<32x512xf32>
    %54 = arith.mulf %20, %53 : vector<32x512xf32>
    %55 = arith.addf %51, %54 : vector<32x512xf32>
    %56 = vector.extract_strided_slice %23 {offsets = [8, 0], sizes = [1, 512], strides = [1, 1]} : vector<9x512xf32> to vector<1x512xf32>
    %57 = vector.broadcast %56 : vector<1x512xf32> to vector<32x512xf32>
    %58 = arith.mulf %22, %57 : vector<32x512xf32>
    %59 = arith.addf %55, %58 : vector<32x512xf32>
    %60 = tpu.iota {dimensions = array<i32: 1>} : vector<2x16x512xi32>
    %61 = vector.shape_cast %60 : vector<2x16x512xi32> to vector<32x512xi32>
    %c0_i32 = arith.constant 0 : i32
    %62 = vector.broadcast %c0_i32 : i32 to vector<32x512xi32>
    %63 = arith.cmpi sgt, %61, %62 : vector<32x512xi32>
    %c1_i32 = arith.constant 1 : i32
    %64 = tpu.dynamic_rotate %34 by %c1_i32 dim 0 : vector<32x512xf32>, i32 -> vector<32x512xf32>
    %cst_16 = arith.constant 0.000000e+00 : f32
    %65 = vector.broadcast %cst_16 : f32 to vector<32x512xf32>
    %66 = arith.select %63, %64, %65 : vector<32x512xi1>, vector<32x512xf32>
    %67 = arith.addf %48, %66 : vector<32x512xf32>
    %c15_i32 = arith.constant 15 : i32
    %68 = vector.broadcast %c15_i32 : i32 to vector<32x512xi32>
    %69 = arith.cmpi slt, %61, %68 : vector<32x512xi32>
    %c31_i32 = arith.constant 31 : i32
    %70 = tpu.dynamic_rotate %59 by %c31_i32 dim 0 : vector<32x512xf32>, i32 -> vector<32x512xf32>
    %cst_17 = arith.constant 0.000000e+00 : f32
    %71 = vector.broadcast %cst_17 : f32 to vector<32x512xf32>
    %72 = arith.select %69, %70, %71 : vector<32x512xi1>, vector<32x512xf32>
    %73 = arith.addf %67, %72 : vector<32x512xf32>
    %cst_18 = arith.constant 5.000000e-01 : f32
    %74 = vector.broadcast %cst_18 : f32 to vector<32x512xf32>
    %75 = arith.mulf %74, %73 : vector<32x512xf32>
    %cst_19 = arith.constant 0.797884583 : f32
    %76 = vector.broadcast %cst_19 : f32 to vector<32x512xf32>
    %77 = arith.mulf %76, %73 : vector<32x512xf32>
    %cst_20 = arith.constant 4.471500e-02 : f32
    %78 = vector.broadcast %cst_20 : f32 to vector<32x512xf32>
    %79 = arith.mulf %78, %73 : vector<32x512xf32>
    %80 = arith.mulf %79, %73 : vector<32x512xf32>
    %cst_21 = arith.constant 1.000000e+00 : f32
    %81 = vector.broadcast %cst_21 : f32 to vector<32x512xf32>
    %82 = arith.addf %81, %80 : vector<32x512xf32>
    %83 = arith.mulf %77, %82 : vector<32x512xf32>
    %84 = math.tanh %83 : vector<32x512xf32>
    %cst_22 = arith.constant 1.000000e+00 : f32
    %85 = vector.broadcast %cst_22 : f32 to vector<32x512xf32>
    %86 = arith.addf %85, %84 : vector<32x512xf32>
    %87 = arith.mulf %75, %86 : vector<32x512xf32>
    %cst_23 = arith.constant dense<0.000000e+00> : vector<32x128xf32>
    %88 = tpu.matmul %87, %2, %cst_23 {dimension_numbers = #tpu.dot_dimension_numbers<[1], [0], [0], [1], [0, 0, 1, 1], [], []>} : vector<32x512xf32>, vector<512x128xf32>, vector<32x128xf32> -> vector<32x128xf32>
    %c0_24 = arith.constant 0 : index
    %c0_25 = arith.constant 0 : index
    %89 = vector.load %arg7[%c0_24, %c0_25] : memref<1x128xf32, #tpu.memory_space<vmem>>, vector<1x128xf32>
    %90 = vector.broadcast %89 : vector<1x128xf32> to vector<32x128xf32>
    %91 = arith.addf %88, %90 : vector<32x128xf32>
    %92 = arith.addf %91, %0 : vector<32x128xf32>
    %cst_26 = arith.constant 5.000000e-01 : f32
    %93 = vector.broadcast %cst_26 : f32 to vector<32x128xf32>
    %94 = arith.mulf %93, %92 : vector<32x128xf32>
    %cst_27 = arith.constant 0.797884583 : f32
    %95 = vector.broadcast %cst_27 : f32 to vector<32x128xf32>
    %96 = arith.mulf %95, %92 : vector<32x128xf32>
    %cst_28 = arith.constant 4.471500e-02 : f32
    %97 = vector.broadcast %cst_28 : f32 to vector<32x128xf32>
    %98 = arith.mulf %97, %92 : vector<32x128xf32>
    %99 = arith.mulf %98, %92 : vector<32x128xf32>
    %cst_29 = arith.constant 1.000000e+00 : f32
    %100 = vector.broadcast %cst_29 : f32 to vector<32x128xf32>
    %101 = arith.addf %100, %99 : vector<32x128xf32>
    %102 = arith.mulf %96, %101 : vector<32x128xf32>
    %103 = math.tanh %102 : vector<32x128xf32>
    %cst_30 = arith.constant 1.000000e+00 : f32
    %104 = vector.broadcast %cst_30 : f32 to vector<32x128xf32>
    %105 = arith.addf %104, %103 : vector<32x128xf32>
    %106 = arith.mulf %94, %105 : vector<32x128xf32>
    %c0_31 = arith.constant 0 : index
    %c0_32 = arith.constant 0 : index
    %107 = vector.load %arg8[%c0_31, %c0_32] : memref<32x128xf32, #tpu.memory_space<vmem>>, vector<32x128xf32>
    tpu.vector_store %arg8[%c0_31, %c0_32], %106 {strides = array<i32>} : memref<32x128xf32, #tpu.memory_space<vmem>>, vector<32x128xf32>,
    return
  }
  func.func @transform_0(%arg0: i32) -> (i32, i32) {
    %c0_i32 = arith.constant 0 : i32
    %c0_i32_0 = arith.constant 0 : i32
    return %arg0, %c0_i32 : i32, i32
  }
  func.func @transform_1(%arg0: i32) -> (i32, i32) {
    %c0_i32 = arith.constant 0 : i32
    %c0_i32_0 = arith.constant 0 : i32
    %c0_i32_1 = arith.constant 0 : i32
    return %c0_i32, %c0_i32_0 : i32, i32
  }
  func.func @transform_2(%arg0: i32) -> (i32, i32) {
    %c0_i32 = arith.constant 0 : i32
    %c0_i32_0 = arith.constant 0 : i32
    %c0_i32_1 = arith.constant 0 : i32
    return %c0_i32, %c0_i32_0 : i32, i32
  }
  func.func @transform_3(%arg0: i32) -> (i32, i32) {
    %c0_i32 = arith.constant 0 : i32
    %c0_i32_0 = arith.constant 0 : i32
    %c0_i32_1 = arith.constant 0 : i32
    return %c0_i32, %c0_i32_0 : i32, i32
  }
  func.func @transform_4(%arg0: i32) -> (i32, i32) {
    %c0_i32 = arith.constant 0 : i32
    %c0_i32_0 = arith.constant 0 : i32
    %c0_i32_1 = arith.constant 0 : i32
    return %c0_i32, %c0_i32_0 : i32, i32
  }
  func.func @transform_5(%arg0: i32) -> (i32, i32) {
    %c0_i32 = arith.constant 0 : i32
    %c0_i32_0 = arith.constant 0 : i32
    %c0_i32_1 = arith.constant 0 : i32
    return %c0_i32, %c0_i32_0 : i32, i32
  }
  func.func @transform_6(%arg0: i32) -> (i32, i32) {
    %c0_i32 = arith.constant 0 : i32
    %c0_i32_0 = arith.constant 0 : i32
    %c0_i32_1 = arith.constant 0 : i32
    return %c0_i32, %c0_i32_0 : i32, i32
  }
  func.func @transform_7(%arg0: i32) -> (i32, i32) {
    %c0_i32 = arith.constant 0 : i32
    %c0_i32_0 = arith.constant 0 : i32
    return %arg0, %c0_i32 : i32, i32
  }
}

</mosaic_0001>

<bundles_post_ra>
// kernel: tpu_custom_call.1
= control target key start
LH: loop header
LB: loop body
LE: loop exit
PB: predicated region body
PF: predicated region fallthrough
CT: control target
= control target key end

     0   :  { %12 = vsyncpa [#allocation3], 0  ;;  %s3469_s0 = inlined_call_operand.hbm [shape: f32[32,128], index: 0, kind: input, shape index: {}]   ;;  %s3470_s1 = inlined_call_operand.hbm [shape: f32[128,512], index: 1, kind: input, shape index: {}]   ;;  %s3471_s2 = inlined_call_operand.vmem [shape: f32[1,512], index: 2, kind: input, shape index: {}]   ;;  %s3472_s3 = inlined_call_operand.hbm [shape: f32[9,512], index: 3, kind: input, shape index: {}]   ;;  %s3473_s4 = inlined_call_operand.vmem [shape: f32[1,512], index: 4, kind: input, shape index: {}]   ;;  %s3474_s5 = inlined_call_operand.hbm [shape: f32[512,128], index: 5, kind: input, shape index: {}]   ;;  %s3475_s6 = inlined_call_operand.vmem [shape: f32[1,128], index: 6, kind: input, shape index: {}]   ;;  %s3476_s7 = inlined_call_operand.hbm [shape: f32[32,128], index: 7, kind: output, shape index: {}]  }
   0x1   :  { %13 = vsyncpa [#allocation6], 0 }
   0x2   :  { %14 = vsyncpa [#allocation9], 0 }
   0x3   :  { %15 = vsyncpa [#allocation4], 0  ;;  %s2035_s24 = smov [#allocation5]   ;;  %s1917_s28 = scalar_lea.hbm %s3470_s1, 8192 }
   0x4   :  { %s33_s25 = sshll.u32 %s2035_s24, 4  ;;  %p1918_p0 = scmp.ne.s32.totalorder %s3470_s1, %s1917_s28  ;;  %s34_s25 = int_to_ptr.vmem [resolvable:$true] %s33_s25 }
   0x5   :  { %p1921_p1 = scmp.lt.u32.totalorder %s1917_s28, %s3470_s1 }
   0x7   :  { %p1923_p2 = pnand %p1921_p1, %p1918_p0 }
   0x9   :  { %1926 = shalt.err (!%p1923_p2)
}
   0xa   :  { %s1927_s10 = scalar_lea.vmem %s34_s25, 8192  ;;  %p1932_p4 = scmp.lt.s32.totalorder %s34_s25, %s34_s25 }
   0xb   :  { %p1928_p3 = scmp.ne.s32.totalorder %s34_s25, %s1927_s10  ;;  %p1933_p5 = scmp.lt.s32.totalorder %s1927_s10, %s1927_s10 }
   0xd   :  { %p1934_p6 = por %p1933_p5, %p1932_p4 }
   0xf   :  { %p1935_p7 = pnand %p1934_p6, %p1928_p3 }
  0x11   :  { %1938 = shalt.err (!%p1935_p7)
}
  0x12   :  { %s2036_s11 = smov 512   ;;  %s2037_s12 = smov 32  }
  0x13   :  { %39 = dma.hbm_to_vmem [thread:$0]  %s3470_s1, 8192, %s34_s25, [#allocation6], %s2036_s11, %s2036_s11, %s2037_s12  }
  0x14   :  { %s2038_s15 = smov [#allocation2]   ;;  %s1939_s19 = scalar_lea.hbm %s3469_s0, 512 }
  0x15   :  { %s21_s16 = sshll.u32 %s2038_s15, 4  ;;  %p1940_p8 = scmp.ne.s32.totalorder %s3469_s0, %s1939_s19  ;;  %s22_s16 = int_to_ptr.vmem [resolvable:$true] %s21_s16 }
  0x16   :  { %p1943_p9 = scmp.lt.u32.totalorder %s1939_s19, %s3469_s0 }
  0x18   :  { %p1945_p10 = pnand %p1943_p9, %p1940_p8 }
  0x1a   :  { %1948 = shalt.err (!%p1945_p10)
}
  0x1b   :  { %s1949_s24 = scalar_lea.vmem %s22_s16, 512  ;;  %p1954_p12 = scmp.lt.s32.totalorder %s22_s16, %s22_s16 }
  0x1c   :  { %p1950_p11 = scmp.ne.s32.totalorder %s22_s16, %s1949_s24  ;;  %p1955_p13 = scmp.lt.s32.totalorder %s1949_s24, %s1949_s24 }
  0x1e   :  { %p1956_p0 = por %p1955_p13, %p1954_p12 }
  0x20   :  { %p1957_p1 = pnand %p1956_p0, %p1950_p11 }
  0x22   :  { %1960 = shalt.err (!%p1957_p1)
}
  0x23   :  { %s2039_s1 = smov 128   ;;  %s2040_s25 = smov 8  }
  0x24   :  { %27 = dma.hbm_to_vmem [thread:$0]  %s3469_s0, 512, %s22_s16, [#allocation3], %s2039_s1, %s2039_s1, %s2040_s25  }
  0x25   :  { %s2041_s28 = smov [#allocation7]   ;;  %s2042_s30 = smov [#allocation8]  }
  0x26   :  { %s47_s29 = sshll.u32 %s2041_s28, 4  ;;  %s61_s8 = sshll.u32 %s2042_s30, 4  ;;  %s48_s29 = int_to_ptr.vmem [resolvable:$true] %s47_s29  ;;  %s2116_s8 = int_to_ptr.vmem [resolvable:$true] %s61_s8 }
  0x27   :  { %s1961_s13 = scalar_lea.hbm %s3472_s3, 1024 }
  0x28   :  { %p1962_p2 = scmp.ne.s32.totalorder %s3472_s3, %s1961_s13  ;;  %p1965_p3 = scmp.lt.u32.totalorder %s1961_s13, %s3472_s3 }
  0x2a   :  { %p1967_p4 = pnand %p1965_p3, %p1962_p2 }
  0x2c   :  { %1970 = shalt.err (!%p1967_p4)
}
  0x2d   :  { %s1971_s0 = scalar_lea.vmem %s48_s29, 1024  ;;  %p1976_p6 = scmp.lt.s32.totalorder %s48_s29, %s48_s29 }
  0x2e   :  { %p1972_p5 = scmp.ne.s32.totalorder %s48_s29, %s1971_s0  ;;  %p1977_p7 = scmp.lt.s32.totalorder %s1971_s0, %s1971_s0 }
  0x30   :  { %p1978_p8 = por %p1977_p7, %p1976_p6 }
  0x32   :  { %p1979_p9 = pnand %p1978_p8, %p1972_p5 }
  0x34   :  { %1982 = shalt.err (!%p1979_p9)
}
  0x35   :  { %53 = dma.hbm_to_vmem [thread:$0]  %s3472_s3, 1024, %s48_s29, [#allocation6], %s2036_s11, %s2036_s11, %s2037_s12  }
  0x36   :  { %s1983_s22 = scalar_lea.hbm %s3474_s5, 8192 }
  0x37   :  { %p1984_p10 = scmp.ne.s32.totalorder %s3474_s5, %s1983_s22  ;;  %p1987_p11 = scmp.lt.u32.totalorder %s1983_s22, %s3474_s5 }
  0x39   :  { %p1989_p12 = pnand %p1987_p11, %p1984_p10 }
  0x3b   :  { %1992 = shalt.err (!%p1989_p12)
}
  0x3c   :  { %s1993_s28 = scalar_lea.vmem %s2116_s8, 8192  ;;  %p1998_p0 = scmp.lt.s32.totalorder %s2116_s8, %s2116_s8 }
  0x3d   :  { %p1994_p13 = scmp.ne.s32.totalorder %s2116_s8, %s1993_s28  ;;  %p1999_p1 = scmp.lt.s32.totalorder %s1993_s28, %s1993_s28 }
  0x3f   :  { %p2000_p2 = por %p1999_p1, %p1998_p0 }
  0x41   :  { %p2001_p3 = pnand %p2000_p2, %p1994_p13 }
  0x43   :  { %2004 = shalt.err (!%p2001_p3)
}
  0x44   :  { %67 = dma.hbm_to_vmem [thread:$0]  %s3474_s5, 8192, %s2116_s8, [#allocation9], %s2039_s1, %s2039_s1, %s2040_s25  }
  0x45   :  { %2027 = dma.done.wait [#allocation3], 512  }
  0x46   :  { %2028 = vsyncadd [#allocation3], 4294966784 }
  0x47   :  { %2029 = dma.done.wait [#allocation6], 9216  }
  0x48   :  { %2030 = vsyncadd [#allocation6], 4294958080 }
  0x49   :  { %2031 = dma.done.wait [#allocation9], 8192  }
  0x4a   :  { %2032 = vsyncadd [#allocation9], 4294959104  ;;  %v2043_v0 = vmov 0.0   ;;  %v87_v1 = vld [vmem:[#allocation5 + $0x8] sm:$0xff]  ;;  %v89_v3 = vld [vmem:[#allocation5 + $0x18] sm:$0xff] }
  0x4b   :  { %300 = vmatprep.mubr.f32.mxu0 %v2043_v0  ;;  %389 = vmatprep.mubr.f32.mxu1 %v2043_v0  ;;  %v91_v2 = vld [vmem:[#allocation5 + $0x28] sm:$0xff]  ;;  %v93_v5 = vld [vmem:[#allocation5 + $0x38] sm:$0xff]  ;;  %v86_v6 = vld [vmem:[#allocation5] sm:$0xff] }
  0x4c   :  { %v1702_v4 = vpack.c.bf16 %v91_v2, %v87_v1  ;;  %v90_v7 = vld [vmem:[#allocation5 + $0x20] sm:$0xff]  ;;  %v1734_v8 = vpack.c.bf16 %v93_v5, %v89_v3  ;;  %v88_v10 = vld [vmem:[#allocation5 + $0x10] sm:$0xff]  ;;  %v95_v12 = vld [vmem:[#allocation5 + $0x48] sm:$0xff] }
  0x4d   :  { %v1704_v9 = vpack.c.bf16 %v90_v7, %v86_v6  ;;  %v92_v11 = vld [vmem:[#allocation5 + $0x30] sm:$0xff]  ;;  %v99_v14 = vld [vmem:[#allocation5 + $0x68] sm:$0xff]  ;;  %v97_v15 = vld [vmem:[#allocation5 + $0x58] sm:$0xff] }
  0x4e   :  { %1703 = vmatprep.subr.bf16.mxu0 %v1702_v4  ;;  %v1736_v13 = vpack.c.bf16 %v92_v11, %v88_v10  ;;  %v101_v16 = vld [vmem:[#allocation5 + $0x78] sm:$0xff]  ;;  %1735 = vmatprep.subr.bf16.mxu1 %v1734_v8  ;;  %v1706_v17 = vpack.c.bf16 %v99_v14, %v95_v12  ;;  %v94_v19 = vld [vmem:[#allocation5 + $0x40] sm:$0xff]  ;;  %v96_v21 = vld [vmem:[#allocation5 + $0x50] sm:$0xff] }
  0x4f   :  { %1705 = vmatpush1.bf16.msra.mxu0 %v1704_v9  ;;  %v1738_v18 = vpack.c.bf16 %v101_v16, %v97_v15  ;;  %v98_v20 = vld [vmem:[#allocation5 + $0x60] sm:$0xff]  ;;  %v100_v23 = vld [vmem:[#allocation5 + $0x70] sm:$0xff]  ;;  %v103_v24 = vld [vmem:[#allocation5 + $0x88] sm:$0xff] }
  0x50   :  { %1737 = vmatpush1.bf16.msra.mxu1 %v1736_v13  ;;  %v1708_v22 = vpack.c.bf16 %v98_v20, %v94_v19  ;;  %v107_v25 = vld [vmem:[#allocation5 + $0xa8] sm:$0xff]  ;;  %1707 = vmatprep.subr.bf16.mxu0 %v1706_v17  ;;  %v1740_v26 = vpack.c.bf16 %v100_v23, %v96_v21  ;;  %v105_v28 = vld [vmem:[#allocation5 + $0x98] sm:$0xff]  ;;  %v102_v30 = vld [vmem:[#allocation5 + $0x80] sm:$0xff] }
  0x51   :  { %1739 = vmatprep.subr.bf16.mxu1 %v1738_v18  ;;  %v1710_v27 = vpack.c.bf16 %v107_v25, %v103_v24  ;;  %v109_v29 = vld [vmem:[#allocation5 + $0xb8] sm:$0xff]  ;;  %v106_v32 = vld [vmem:[#allocation5 + $0xa0] sm:$0xff]  ;;  %v104_v33 = vld [vmem:[#allocation5 + $0x90] sm:$0xff] }
  0x52   :  { %v1742_v31 = vpack.c.bf16 %v109_v29, %v105_v28  ;;  %v108_v34 = vld [vmem:[#allocation5 + $0xb0] sm:$0xff]  ;;  %v1712_v35 = vpack.c.bf16 %v106_v32, %v102_v30  ;;  %v111_v36 = vld [vmem:[#allocation5 + $0xc8] sm:$0xff]  ;;  %v113_v38 = vld [vmem:[#allocation5 + $0xd8] sm:$0xff] }
  0x53   :  { %1709 = vmatpush1.bf16.msra.mxu0 %v1708_v22  ;;  %v115_v37 = vld [vmem:[#allocation5 + $0xe8] sm:$0xff]  ;;  %v1744_v39 = vpack.c.bf16 %v108_v34, %v104_v33  ;;  %v117_v41 = vld [vmem:[#allocation5 + $0xf8] sm:$0xff]  ;;  %v110_v42 = vld [vmem:[#allocation5 + $0xc0] sm:$0xff] }
  0x54   :  { %1741 = vmatpush1.bf16.msra.mxu1 %v1740_v26  ;;  %1711 = vmatprep.subr.bf16.mxu0 %v1710_v27  ;;  %v1714_v40 = vpack.c.bf16 %v115_v37, %v111_v36  ;;  %v114_v43 = vld [vmem:[#allocation5 + $0xe0] sm:$0xff]  ;;  %v1746_v44 = vpack.c.bf16 %v117_v41, %v113_v38  ;;  %v112_v45 = vld [vmem:[#allocation5 + $0xd0] sm:$0xff]  ;;  %v119_v47 = vld [vmem:[#allocation5 + $0x108] sm:$0xff]  ;;  %v216_v38 = vlaneseq }
  0x55   :  { %1743 = vmatprep.subr.bf16.mxu1 %v1742_v31  ;;  %v116_v46 = vld [vmem:[#allocation5 + $0xf0] sm:$0xff]  ;;  %v123_v48 = vld [vmem:[#allocation5 + $0x128] sm:$0xff]  ;;  %v121_v49 = vld [vmem:[#allocation5 + $0x118] sm:$0xff]  ;;  %v1716_v51 = vpack.c.bf16 %v114_v43, %v110_v42 }
  0x56   :  { %v125_v50 = vld [vmem:[#allocation5 + $0x138] sm:$0xff]  ;;  %v1748_v52 = vpack.c.bf16 %v116_v46, %v112_v45  ;;  %v1718_v53 = vpack.c.bf16 %v123_v48, %v119_v47  ;;  %v118_v54 = vld [vmem:[#allocation5 + $0x100] sm:$0xff]  ;;  %v120_v56 = vld [vmem:[#allocation5 + $0x110] sm:$0xff] }
  0x57   :  { %1713 = vmatpush1.bf16.msra.mxu0 %v1712_v35  ;;  %v122_v55 = vld [vmem:[#allocation5 + $0x120] sm:$0xff]  ;;  %v1750_v57 = vpack.c.bf16 %v125_v50, %v121_v49  ;;  %v124_v58 = vld [vmem:[#allocation5 + $0x130] sm:$0xff]  ;;  %v127_v59 = vld [vmem:[#allocation5 + $0x148] sm:$0xff] }
  0x58   :  { %1745 = vmatpush1.bf16.msra.mxu1 %v1744_v39  ;;  %1715 = vmatprep.subr.bf16.mxu0 %v1714_v40  ;;  %v131_v60 = vld [vmem:[#allocation5 + $0x168] sm:$0xff]  ;;  %v129_v61 = vld [vmem:[#allocation5 + $0x158] sm:$0xff]  ;;  %v1720_v63 = vpack.c.bf16 %v122_v55, %v118_v54  ;;  %v1752_v1 = vpack.c.bf16 %v124_v58, %v120_v56  ;;  %v126_v3 = vld [vmem:[#allocation5 + $0x140] sm:$0xff]  ;;  %v2162_v39 = vshrl.u32 %v216_v38, 7 }
  0x59   :  { %1747 = vmatprep.subr.bf16.mxu1 %v1746_v44  ;;  %v133_v62 = vld [vmem:[#allocation5 + $0x178] sm:$0xff]  ;;  %v1722_v2 = vpack.c.bf16 %v131_v60, %v127_v59  ;;  %v130_v4 = vld [vmem:[#allocation5 + $0x160] sm:$0xff]  ;;  %v128_v5 = vld [vmem:[#allocation5 + $0x150] sm:$0xff] }
  0x5a   :  { %v1754_v6 = vpack.c.bf16 %v133_v62, %v129_v61  ;;  %v132_v7 = vld [vmem:[#allocation5 + $0x170] sm:$0xff]  ;;  %v135_v8 = vld [vmem:[#allocation5 + $0x188] sm:$0xff]  ;;  %v137_v10 = vld [vmem:[#allocation5 + $0x198] sm:$0xff]  ;;  %v1724_v12 = vpack.c.bf16 %v130_v4, %v126_v3  ;;  %v2165_v40 = vsub.s32 0, %v2162_v39  ;;  %v2171_v42 = vsub.s32 2, %v2162_v39 }
  0x5b   :  { %1717 = vmatpush1.bf16.msra.mxu0 %v1716_v51  ;;  %v139_v9 = vld [vmem:[#allocation5 + $0x1a8] sm:$0xff]  ;;  %v141_v11 = vld [vmem:[#allocation5 + $0x1b8] sm:$0xff]  ;;  %v1756_v13 = vpack.c.bf16 %v132_v7, %v128_v5  ;;  %v134_v15 = vld [vmem:[#allocation5 + $0x180] sm:$0xff]  ;;  %v2174_v43 = vsub.s32 1, %v2162_v39  ;;  %vm1109_vm2 = vcmp.lt.s32.totalorder %v2162_v39, 1  ;;  %vm1176_vm3 = vcmp.lt.s32.totalorder %v2162_v39, 7 }
  0x5c   :  { %1749 = vmatpush1.bf16.msra.mxu1 %v1748_v52  ;;  %1719 = vmatprep.subr.bf16.mxu0 %v1718_v53  ;;  %v1726_v14 = vpack.c.bf16 %v139_v9, %v135_v8  ;;  %v138_v16 = vld [vmem:[#allocation5 + $0x1a0] sm:$0xff]  ;;  %v136_v17 = vld [vmem:[#allocation5 + $0x190] sm:$0xff]  ;;  %v1758_v18 = vpack.c.bf16 %v141_v11, %v137_v10  ;;  %v143_v20 = vld [vmem:[#allocation5 + $0x1c8] sm:$0xff]  ;;  %vm1091_vm4 = vcmp.gt.s32.totalorder %v2162_v39, 0 }
  0x5d   :  { %1751 = vmatprep.subr.bf16.mxu1 %v1750_v57  ;;  %v140_v19 = vld [vmem:[#allocation5 + $0x1b0] sm:$0xff]  ;;  %v147_v21 = vld [vmem:[#allocation5 + $0x1e8] sm:$0xff]  ;;  %v145_v22 = vld [vmem:[#allocation5 + $0x1d8] sm:$0xff]  ;;  %v1728_v24 = vpack.c.bf16 %v138_v16, %v134_v15 }
  0x5e   :  { %v149_v23 = vld [vmem:[#allocation5 + $0x1f8] sm:$0xff]  ;;  %v1760_v25 = vpack.c.bf16 %v140_v19, %v136_v17  ;;  %v1730_v26 = vpack.c.bf16 %v147_v21, %v143_v20  ;;  %v142_v27 = vld [vmem:[#allocation5 + $0x1c0] sm:$0xff]  ;;  %v144_v30 = vld [vmem:[#allocation5 + $0x1d0] sm:$0xff] }
  0x5f   :  { %1721 = vmatpush1.bf16.msra.mxu0 %v1720_v63  ;;  %v146_v28 = vld [vmem:[#allocation5 + $0x1e0] sm:$0xff]  ;;  %v1762_v29 = vpack.c.bf16 %v149_v23, %v145_v22  ;;  %v148_v31 = vld [vmem:[#allocation5 + $0x1f0] sm:$0xff]  ;;  %v83_v35 = vld [vmem:[#allocation2 + $0x8] sm:$0xff] }
  0x60   :  { %1753 = vmatpush1.bf16.msra.mxu1 %v1752_v1  ;;  %1723 = vmatprep.subr.bf16.mxu0 %v1722_v2  ;;  %v1732_v32 = vpack.c.bf16 %v146_v28, %v142_v27  ;;  %v1764_v33 = vpack.c.bf16 %v148_v31, %v144_v30  ;;  %v82_v34 = vld [vmem:[#allocation2] sm:$0xff]  ;;  %v84_v36 = vld [vmem:[#allocation2 + $0x10] sm:$0xff]  ;;  %v85_v37 = vld [vmem:[#allocation2 + $0x18] sm:$0xff] }
  0x61   :  { %1755 = vmatprep.subr.bf16.mxu1 %v1754_v6  ;;  %v214_v41 = vld [vmem:[%s3471_s2] sm:$0xf]  ;;  %s2044_s2 = smov 96  }
  0x62   :  { %v2180_v44 = vrot.slane %v214_v41, %v2165_v40  ;;  %v2183_v45 = vrot.slane %v214_v41, %v2171_v42  ;;  %v2186_v46 = vrot.slane %v214_v41, %v2174_v43 }
  0x63   :  { %1725 = vmatpush1.bf16.msra.mxu0 %v1724_v12 }
  0x64   :  { %1757 = vmatpush1.bf16.msra.mxu1 %v1756_v13  ;;  %1727 = vmatprep.subr.bf16.mxu0 %v1726_v14 }
  0x65   :  { %1759 = vmatprep.subr.bf16.mxu1 %v1758_v18 }
  0x67   :  { %1729 = vmatpush1.bf16.msra.mxu0 %v1728_v24 }
  0x68   :  { %1761 = vmatpush1.bf16.msra.mxu1 %v1760_v25  ;;  %1731 = vmatprep.subr.bf16.mxu0 %v1730_v26 }
  0x69   :  { %1763 = vmatprep.subr.bf16.mxu1 %v1762_v29 }
  0x6b   :  { %1733 = vmatpush1.bf16.msra.mxu0 %v1732_v32 }
  0x6c   :  { %1765 = vmatpush1.bf16.msra.mxu1 %v1764_v33 }
  0x6e   :  { %301 = vmatmul.mubr.f32.vlgmr.msra.gmra.mrb[0].mxu0 %v82_v34 }
  0x6f   :  { %390 = vmatmul.mubr.f32.vlgmr.msra.gmra.mrb[0].mxu1 %v82_v34  ;;  %306 = vmatprep.mubr.f32.mxu0 %v2043_v0 }
  0x70   :  { %395 = vmatprep.mubr.f32.mxu1 %v2043_v0 }
  0x72   :  { %307 = vmatmul.mubr.f32.gmra.mrb[2].mxu0 %v83_v35 }
  0x73   :  { %396 = vmatmul.mubr.f32.gmra.mrb[2].mxu1 %v83_v35  ;;  %312 = vmatprep.mubr.f32.mxu0 %v2043_v0 }
  0x74   :  { %401 = vmatprep.mubr.f32.mxu1 %v2043_v0 }
  0x76   :  { %313 = vmatmul.mubr.f32.gmra.mrb[4].mxu0 %v84_v36 }
  0x77   :  { %402 = vmatmul.mubr.f32.gmra.mrb[4].mxu1 %v84_v36  ;;  %318 = vmatprep.mubr.f32.mxu0 %v2043_v0 }
  0x78   :  { %407 = vmatprep.mubr.f32.mxu1 %v2043_v0  ;;  %v2177_v0 = vsub.s32 3, %v2162_v39 }
  0x7a   :  { %319 = vmatmul.mubr.f32.gmra.mrb[6].mxu0 %v85_v37  ;;  %v2189_v47 = vrot.slane %v214_v41, %v2177_v0 }
  0x7b   :  { %408 = vmatmul.mubr.f32.gmra.mrb[6].mxu1 %v85_v37 }
 0x141   :  { %v302_v48 = vpop.f32.mrb[0].mxu0 }
 0x142   :  { %v2192_v49 = vadd.f32 %v302_v48, %v2180_v44  ;;  %v391_v50 = vpop.f32.mrb[0].mxu1  ;;  %v304_v51 = vpop.f32.mrb[1].mxu0 }
 0x143   :  { %v2195_v52 = vadd.f32 %v391_v50, %v2183_v45  ;;  %v2198_v53 = vadd.f32 %v304_v51, %v2186_v46  ;;  %v393_v54 = vpop.f32.mrb[1].mxu1 }
 0x144   :  { %v446_v55 = vmul.f32 0.044715, %v2192_v49  ;;  %v2202_v56 = vadd.f32 %v393_v54, %v2189_v47  ;;  %v430_v3 = vmul.f32 0.7978846, %v2192_v49 }
 0x145   :  { %v448_v57 = vmul.f32 0.044715, %v2195_v52  ;;  %v447_v59 = vmul.f32 0.044715, %v2198_v53  ;;  %v308_v60 = vpop.f32.mrb[2].mxu0 }
 0x146   :  { %v462_v58 = vmul.f32 %v446_v55, %v2192_v49  ;;  %v432_v61 = vmul.f32 0.7978846, %v2195_v52  ;;  %v449_v63 = vmul.f32 0.044715, %v2202_v56  ;;  %v397_v1 = vpop.f32.mrb[2].mxu1  ;;  %v310_v2 = vpop.f32.mrb[3].mxu0  ;;  %v2225_v23 = vadd.f32 %v308_v60, %v2180_v44 }
 0x147   :  { %v464_v62 = vmul.f32 %v448_v57, %v2195_v52  ;;  %v463_v5 = vmul.f32 %v447_v59, %v2198_v53  ;;  %v2213_v6 = vadd.f32 %v397_v1, %v2183_v45  ;;  %v399_v7 = vpop.f32.mrb[3].mxu1  ;;  %v433_v9 = vmul.f32 0.7978846, %v2202_v56 }
 0x148   :  { %v478_v4 = vadd.f32 1.0, %v462_v58  ;;  %v465_v10 = vmul.f32 %v449_v63, %v2202_v56  ;;  %v431_v13 = vmul.f32 0.7978846, %v2198_v53  ;;  %v2221_v15 = vadd.f32 %v310_v2, %v2186_v46 }
 0x149   :  { %v480_v8 = vadd.f32 1.0, %v464_v62  ;;  %v2217_v11 = vpop.f32.mrb[4].mxu0  ;;  %v479_v14 = vadd.f32 1.0, %v463_v5  ;;  %v452_v20 = vmul.f32 0.044715, %v2213_v6  ;;  %v2245_v51 = vadd.f32 %v399_v7, %v2189_v47 }
 0x14a   :  { %v494_v12 = vmul.f32 %v478_v4, %v430_v3  ;;  %v403_v16 = vpop.f32.mrb[4].mxu1  ;;  %v316_v17 = vpop.f32.mrb[5].mxu0  ;;  %v481_v19 = vadd.f32 1.0, %v465_v10  ;;  %v436_v25 = vmul.f32 0.7978846, %v2213_v6  ;;  %v414_v58 = vmul.f32 0.5, %v2192_v49 }
 0x14b   :  { %v496_v18 = vmul.f32 %v480_v8, %v432_v61  ;;  %v405_v21 = vpop.f32.mrb[5].mxu1  ;;  %v495_v22 = vmul.f32 %v479_v14, %v431_v13  ;;  %v468_v26 = vmul.f32 %v452_v20, %v2213_v6  ;;  %v451_v28 = vmul.f32 0.044715, %v2221_v15 }
 0x14c   :  { %1841 = vtanh.f32 %v494_v12  ;;  %v497_v24 = vmul.f32 %v481_v19, %v433_v9  ;;  %v2235_v32 = vadd.f32 %v403_v16, %v2183_v45  ;;  %v450_v34 = vmul.f32 0.044715, %v2225_v23 }
 0x14d   :  { %1843 = vtanh.f32 %v496_v18  ;;  %v2229_v27 = vpop.f32.mrb[6].mxu0  ;;  %v484_v31 = vadd.f32 1.0, %v468_v26  ;;  %v467_v35 = vmul.f32 %v451_v28, %v2221_v15  ;;  %v435_v37 = vmul.f32 0.7978846, %v2221_v15 }
 0x14e   :  { %1845 = vtanh.f32 %v495_v22  ;;  %v409_v29 = vpop.f32.mrb[6].mxu1  ;;  %v2232_v30 = vpop.f32.mrb[7].mxu0  ;;  %v456_v48 = vmul.f32 0.044715, %v2235_v32  ;;  %v466_v50 = vmul.f32 %v450_v34, %v2225_v23  ;;  %v2248_v54 = vadd.f32 %v316_v17, %v2186_v46 }
 0x14f   :  { %1847 = vtanh.f32 %v497_v24  ;;  %v2237_v33 = vpop.f32.mrb[7].mxu1  ;;  %v500_v36 = vmul.f32 %v484_v31, %v436_v25  ;;  %v483_v41 = vadd.f32 1.0, %v467_v35  ;;  %v440_v60 = vmul.f32 0.7978846, %v2235_v32 }
 0x150   :  { %v472_v55 = vmul.f32 %v456_v48, %v2235_v32  ;;  %v455_v1 = vmul.f32 0.044715, %v2248_v54  ;;  %v2255_v2 = vadd.f32 %v405_v21, %v2189_v47  ;;  %v434_v4 = vmul.f32 0.7978846, %v2225_v23 }
 0x151   :  { %1849 = vtanh.f32 %v500_v36  ;;  %v499_v59 = vmul.f32 %v483_v41, %v435_v37  ;;  %v482_v5 = vadd.f32 1.0, %v466_v50  ;;  %v453_v7 = vmul.f32 0.044715, %v2245_v51 }
 0x152   :  { %v488_v63 = vadd.f32 1.0, %v472_v55  ;;  %v2260_v8 = vadd.f32 %v409_v29, %v2183_v45  ;;  %v415_v12 = vmul.f32 0.5, %v2198_v53  ;;  %v439_v16 = vmul.f32 0.7978846, %v2248_v54 }
 0x153   :  { %1851 = vtanh.f32 %v499_v59  ;;  %v471_v17 = vmul.f32 %v455_v1, %v2248_v54  ;;  %v416_v18 = vmul.f32 0.5, %v2195_v52  ;;  %v457_v45 = vmul.f32 0.044715, %v2255_v2 }
 0x154   :  { %v504_v14 = vmul.f32 %v488_v63, %v440_v60  ;;  %v498_v21 = vmul.f32 %v482_v5, %v434_v4  ;;  %v469_v53 = vmul.f32 %v453_v7, %v2245_v51  ;;  %v460_v24 = vmul.f32 0.044715, %v2260_v8 }
 0x155   :  { %v487_v22 = vadd.f32 1.0, %v471_v17  ;;  %v417_v28 = vmul.f32 0.5, %v2202_v56  ;;  %v473_v52 = vmul.f32 %v457_v45, %v2255_v2  ;;  %v441_v31 = vmul.f32 0.7978846, %v2255_v2 }
 0x156   :  { %v1842_v57 = vpop.eup %1841  ;;  %1853 = vtanh.f32 %v504_v14  ;;  %v476_v34 = vmul.f32 %v460_v24, %v2260_v8  ;;  %v2287_v41 = vadd.f32 %v2229_v27, %v2180_v44  ;;  %v437_v56 = vmul.f32 0.7978846, %v2245_v51 }
 0x157   :  { %v1844_v61 = vpop.eup %1843  ;;  %v526_v62 = vadd.f32 1.0, %v1842_v57  ;;  %v503_v29 = vmul.f32 %v487_v22, %v439_v16  ;;  %v489_v37 = vadd.f32 1.0, %v473_v52  ;;  %1855 = vtanh.f32 %v498_v21 }
 0x158   :  { %v1846_v3 = vpop.eup %1845  ;;  %v528_v10 = vadd.f32 1.0, %v1844_v61  ;;  %v485_v48 = vadd.f32 1.0, %v469_v53  ;;  %v2294_v50 = vadd.f32 %v2217_v11, %v2180_v44  ;;  %v420_v55 = vmul.f32 0.5, %v2213_v6 }
 0x159   :  { %v1848_v49 = vpop.eup %1847  ;;  %v2262_v9 = vmul.f32 %v526_v62, %v414_v58  ;;  %v527_v13 = vadd.f32 1.0, %v1846_v3  ;;  %v444_v57 = vmul.f32 0.7978846, %v2260_v8  ;;  %v2300_v58 = vadd.f32 %v2232_v30, %v2186_v46 }
 0x15a   :  { %v529_v20 = vadd.f32 1.0, %v1848_v49  ;;  %v2275_v26 = vmul.f32 %v528_v10, %v416_v18  ;;  %1857 = vtanh.f32 %v503_v29  ;;  %v505_v27 = vmul.f32 %v489_v37, %v441_v31 }
 0x15b   :  { %v2268_v19 = vmul.f32 %v527_v13, %v415_v12  ;;  %558 = vrot.lane.b32.xlu0 %v2262_v9, %s2037_s12  ;;  %v1850_v25 = vpop.eup %1849  ;;  %v492_v59 = vadd.f32 1.0, %v476_v34  ;;  %v458_v60 = vmul.f32 0.044715, %v2287_v41  ;;  %v501_v6 = vmul.f32 %v485_v48, %v437_v56 }
 0x15c   :  { %v2283_v35 = vmul.f32 %v529_v20, %v417_v28  ;;  %v532_v36 = vadd.f32 1.0, %v1850_v25  ;;  %v454_v11 = vmul.f32 0.044715, %v2294_v50  ;;  %v2312_v46 = vadd.f32 %v2237_v33, %v2189_v47 }
 0x15d   :  { %566 = vrot.lane.b32.xlu1 %v2268_v19, %s2037_s12  ;;  %v1852_v44 = vpop.eup %1851  ;;  %1859 = vtanh.f32 %v505_v27  ;;  %v508_v30 = vmul.f32 %v492_v59, %v444_v57  ;;  %v474_v62 = vmul.f32 %v458_v60, %v2287_v41  ;;  %v459_v63 = vmul.f32 0.044715, %v2300_v58 }
 0x15e   :  { %v2305_v61 = vmul.f32 %v532_v36, %v420_v55  ;;  %v531_v1 = vadd.f32 1.0, %v1852_v44  ;;  %1861 = vtanh.f32 %v501_v6  ;;  %v470_v4 = vmul.f32 %v454_v11, %v2294_v50 }
 0x15f   :  { %574 = vrot.lane.b32.xlu0 %v2275_v26, %s2037_s12  ;;  %v419_v47 = vmul.f32 0.5, %v2221_v15  ;;  %v461_v33 = vmul.f32 0.044715, %v2312_v46  ;;  %1863 = vtanh.f32 %v508_v30  ;;  %v442_v7 = vmul.f32 0.7978846, %v2287_v41 }
 0x160   :  { %v1854_v3 = vpop.eup %1853  ;;  %v490_v49 = vadd.f32 1.0, %v474_v62  ;;  %v475_v10 = vmul.f32 %v459_v63, %v2300_v58  ;;  %v438_v15 = vmul.f32 0.7978846, %v2294_v50  ;;  %v486_v16 = vadd.f32 1.0, %v470_v4 }
 0x161   :  { %633 = vrot.lane.b32.xlu1 %v2283_v35, %s2044_s2  ;;  %v1856_v5 = vpop.eup %1855  ;;  %v2327_v12 = vmul.f32 %v531_v1, %v419_v47  ;;  %v536_v13 = vadd.f32 1.0, %v1854_v3  ;;  %v424_v18 = vmul.f32 0.5, %v2235_v32  ;;  %v477_v20 = vmul.f32 %v461_v33, %v2312_v46 }
 0x162   :  { %v530_v17 = vadd.f32 1.0, %v1856_v5  ;;  %v506_v45 = vmul.f32 %v490_v49, %v442_v7  ;;  %v443_v21 = vmul.f32 0.7978846, %v2300_v58  ;;  %v491_v53 = vadd.f32 1.0, %v475_v10 }
 0x163   :  { %625 = vrot.lane.b32.xlu0 %v2275_v26, %s2044_s2  ;;  %v418_v22 = vmul.f32 0.5, %v2225_v23  ;;  %v2338_v24 = vmul.f32 %v536_v13, %v424_v18  ;;  %v502_v52 = vmul.f32 %v486_v16, %v438_v15  ;;  %v423_v29 = vmul.f32 0.5, %v2248_v54  ;;  %v166_v13 = vld [vmem:[#allocation8 + $0x80] sm:$0xff] }
 0x164   :  { %v1858_v14 = vpop.eup %1857  ;;  %v445_v34 = vmul.f32 0.7978846, %v2312_v46  ;;  %v493_v36 = vadd.f32 1.0, %v477_v20  ;;  %1865 = vtanh.f32 %v506_v45  ;;  %v507_v23 = vmul.f32 %v491_v53, %v443_v21  ;;  %v182_v15 = vld [vmem:[#allocation8 + $0x100] sm:$0xff]  ;;  %v151_v20 = vld [vmem:[#allocation8 + $0x8] sm:$0xff]  ;;  %v200_v53 = vld [vmem:[#allocation8 + $0x190] sm:$0xff] }
 0x165   :  { %576 = vrot.lane.b32.xlu1 %v2305_v61, %s2037_s12  ;;  %v535_v25 = vadd.f32 1.0, %v1858_v14  ;;  %v2342_v32 = vmul.f32 %v530_v17, %v418_v22  ;;  %1867 = vtanh.f32 %v502_v52  ;;  %v425_v54 = vmul.f32 0.5, %v2255_v2  ;;  %v167_v14 = vld [vmem:[#allocation8 + $0x88] sm:$0xff]  ;;  %v150_v18 = vld [vmem:[#allocation8] sm:$0xff]  ;;  %v201_v22 = vld [vmem:[#allocation8 + $0x198] sm:$0xff] }
 0x166   :  { %v509_v57 = vmul.f32 %v493_v36, %v445_v34  ;;  %1869 = vtanh.f32 %v507_v23  ;;  %v421_v27 = vmul.f32 0.5, %v2245_v51  ;;  %v428_v60 = vmul.f32 0.5, %v2260_v8  ;;  %v183_v17 = vld [vmem:[#allocation8 + $0x108] sm:$0xff]  ;;  %v169_v52 = vld [vmem:[#allocation8 + $0x98] sm:$0xff]  ;;  %v152_v36 = vld [vmem:[#allocation8 + $0x10] sm:$0xff] }
 0x167   :  { %609 = vrot.lane.b32.xlu0 %v2262_v9, %s2044_s2  ;;  %v1860_v28 = vpop.eup %1859  ;;  %v2348_v37 = vmul.f32 %v535_v25, %v423_v29  ;;  %v426_v11 = vmul.f32 0.5, %v2287_v41  ;;  %v422_v1 = vmul.f32 0.5, %v2294_v50  ;;  %v427_v4 = vmul.f32 0.5, %v2300_v58  ;;  %v198_v58 = vld [vmem:[#allocation8 + $0x180] sm:$0xff]  ;;  %v184_v29 = vld [vmem:[#allocation8 + $0x110] sm:$0xff]  ;;  %v185_v34 = vld [vmem:[#allocation8 + $0x118] sm:$0xff] }
 0x168   :  { %v1862_v31 = vpop.eup %1861  ;;  %v537_v56 = vadd.f32 1.0, %v1860_v28  ;;  %1871 = vtanh.f32 %v509_v57  ;;  %v429_v5 = vmul.f32 0.5, %v2312_v46  ;;  %v199_v46 = vld [vmem:[#allocation8 + $0x188] sm:$0xff]  ;;  %v1766_v16 = vpack.c.bf16 %v167_v14, %v166_v13  ;;  %v168_v28 = vld [vmem:[#allocation8 + $0x90] sm:$0xff]  ;;  %v153_v23 = vld [vmem:[#allocation8 + $0x18] sm:$0xff] }
 0x169   :  { %627 = vrot.lane.b32.xlu1 %v2305_v61, %s2044_s2  ;;  %v1864_v48 = vpop.eup %1863  ;;  %v533_v55 = vadd.f32 1.0, %v1862_v31  ;;  %v1798_v10 = vpack.c.bf16 %v199_v46, %v198_v58  ;;  %v1800_v45 = vpack.c.bf16 %v183_v17, %v182_v15  ;;  %v1768_v21 = vpack.c.bf16 %v151_v20, %v150_v18  ;;  %v189_v46 = vld [vmem:[#allocation8 + $0x138] sm:$0xff]  ;;  %v207_v17 = vld [vmem:[#allocation8 + $0x1c8] sm:$0xff]  ;;  %v174_v18 = vld [vmem:[#allocation8 + $0xc0] sm:$0xff] }
 0x16a   :  { %v2356_v59 = vmul.f32 %v537_v56, %v425_v54  ;;  %v540_v44 = vadd.f32 1.0, %v1864_v48  ;;  %1767 = vmatprep.subr.bf16.mxu0 %v1766_v16  ;;  %v1802_v25 = vpack.c.bf16 %v201_v22, %v200_v53  ;;  %v1770_v31 = vpack.c.bf16 %v169_v52, %v168_v28  ;;  %v203_v54 = vld [vmem:[#allocation8 + $0x1a8] sm:$0xff]  ;;  %v157_v13 = vld [vmem:[#allocation8 + $0x38] sm:$0xff]  ;;  %v206_v16 = vld [vmem:[#allocation8 + $0x1c0] sm:$0xff] }
 0x16b   :  { %582 = vrot.lane.b32.xlu0 %v2283_v35, %s2037_s12  ;;  %v2361_v6 = vmul.f32 %v533_v55, %v421_v27  ;;  %1799 = vmatprep.subr.bf16.mxu1 %v1798_v10  ;;  %v1804_v56 = vpack.c.bf16 %v185_v34, %v184_v29  ;;  %v1772_v48 = vpack.c.bf16 %v153_v23, %v152_v36  ;;  %v202_v55 = vld [vmem:[#allocation8 + $0x1a0] sm:$0xff]  ;;  %v156_v10 = vld [vmem:[#allocation8 + $0x30] sm:$0xff]  ;;  %v191_v53 = vld [vmem:[#allocation8 + $0x148] sm:$0xff] }
 0x16c   :  { %v2365_v2 = vmul.f32 %v540_v44, %v428_v60  ;;  %1801 = vmatpush3.bf16.msra.mxu1 %v1800_v45  ;;  %1769 = vmatpush3.bf16.msra.mxu0 %v1768_v21  ;;  %v1806_v57 = vpack.c.bf16 %v203_v54, %v202_v55  ;;  %v170_v27 = vld [vmem:[#allocation8 + $0xa0] sm:$0xff]  ;;  %v171_v60 = vld [vmem:[#allocation8 + $0xa8] sm:$0xff]  ;;  %v1780_v15 = vpack.c.bf16 %v157_v13, %v156_v10  ;;  %v208_v29 = vld [vmem:[#allocation8 + $0x1d0] sm:$0xff] }
 0x16d   :  { %568 = vrot.lane.b32.xlu1 %v2327_v12, %s2037_s12  ;;  %1803 = vmatprep.subr.bf16.mxu1 %v1802_v25  ;;  %v186_v44 = vld [vmem:[#allocation8 + $0x120] sm:$0xff]  ;;  %v1814_v20 = vpack.c.bf16 %v207_v17, %v206_v16  ;;  %v175_v45 = vld [vmem:[#allocation8 + $0xc8] sm:$0xff]  ;;  %v209_v34 = vld [vmem:[#allocation8 + $0x1d8] sm:$0xff] }
 0x16e   :  { %v1866_v51 = vpop.eup %1865  ;;  %1771 = vmatprep.subr.bf16.mxu0 %v1770_v31  ;;  %v190_v21 = vld [vmem:[#allocation8 + $0x140] sm:$0xff]  ;;  %v1782_v22 = vpack.c.bf16 %v175_v45, %v174_v18  ;;  %v159_v52 = vld [vmem:[#allocation8 + $0x48] sm:$0xff]  ;;  %v176_v36 = vld [vmem:[#allocation8 + $0xd0] sm:$0xff] }
 0x16f   :  { %617 = vrot.lane.b32.xlu0 %v2268_v19, %s2044_s2  ;;  %v1868_v8 = vpop.eup %1867  ;;  %v538_v30 = vadd.f32 1.0, %v1866_v51  ;;  %v1774_v51 = vpack.c.bf16 %v171_v60, %v170_v27  ;;  %v1816_v25 = vpack.c.bf16 %v191_v53, %v190_v21  ;;  %v158_v28 = vld [vmem:[#allocation8 + $0x40] sm:$0xff]  ;;  %v177_v23 = vld [vmem:[#allocation8 + $0xd8] sm:$0xff]  ;;  %v192_v55 = vld [vmem:[#allocation8 + $0x150] sm:$0xff]  ;;  %v828_v53 = vsub.s32 4, %v2162_v39 }
 0x170   :  { %v1870_v62 = vpop.eup %1869  ;;  %v534_v63 = vadd.f32 1.0, %v1868_v8  ;;  %1805 = vmatpush3.bf16.msra.mxu1 %v1804_v56  ;;  %1773 = vmatpush3.bf16.msra.mxu0 %v1772_v48  ;;  %v187_v8 = vld [vmem:[#allocation8 + $0x128] sm:$0xff]  ;;  %v1784_v31 = vpack.c.bf16 %v159_v52, %v158_v28  ;;  %v1818_v56 = vpack.c.bf16 %v209_v34, %v208_v29  ;;  %v1786_v48 = vpack.c.bf16 %v177_v23, %v176_v36  ;;  %v193_v54 = vld [vmem:[#allocation8 + $0x158] sm:$0xff]  ;;  %v164_v18 = vld [vmem:[#allocation8 + $0x70] sm:$0xff] }
 0x171   :  { %578 = vrot.lane.b32.xlu1 %v2338_v24, %s2037_s12  ;;  %v2377_v3 = vmul.f32 %v538_v30, %v426_v11  ;;  %v539_v47 = vadd.f32 1.0, %v1870_v62  ;;  %v154_v11 = vld [vmem:[#allocation8 + $0x20] sm:$0xff]  ;;  %v155_v30 = vld [vmem:[#allocation8 + $0x28] sm:$0xff]  ;;  %1807 = vmatprep.subr.bf16.mxu1 %v1806_v57  ;;  %v1808_v62 = vpack.c.bf16 %v187_v8, %v186_v44  ;;  %v160_v57 = vld [vmem:[#allocation8 + $0x50] sm:$0xff]  ;;  %v1820_v27 = vpack.c.bf16 %v193_v54, %v192_v55 }
 0x172   :  { %v1872_v41 = vpop.eup %1871  ;;  %v2382_v33 = vmul.f32 %v534_v63, %v422_v1  ;;  %v1776_v63 = vpack.c.bf16 %v155_v30, %v154_v11  ;;  %1775 = vmatprep.subr.bf16.mxu0 %v1774_v51  ;;  %v204_v1 = vld [vmem:[#allocation8 + $0x1b0] sm:$0xff]  ;;  %v161_v60 = vld [vmem:[#allocation8 + $0x58] sm:$0xff]  ;;  %v210_v44 = vld [vmem:[#allocation8 + $0x1e0] sm:$0xff] }
 0x173   :  { %560 = vrot.lane.b32.xlu0 %v2342_v32, %s2037_s12  ;;  %v541_v7 = vadd.f32 1.0, %v1872_v41  ;;  %v2387_v49 = vmul.f32 %v539_v47, %v427_v4  ;;  %v205_v4 = vld [vmem:[#allocation8 + $0x1b8] sm:$0xff]  ;;  %v172_v41 = vld [vmem:[#allocation8 + $0xb0] sm:$0xff]  ;;  %v211_v51 = vld [vmem:[#allocation8 + $0x1e8] sm:$0xff]  ;;  %v1788_v8 = vpack.c.bf16 %v161_v60, %v160_v57 }
 0x174   :  { %1809 = vmatpush3.bf16.msra.mxu1 %v1808_v62  ;;  %1777 = vmatpush3.bf16.msra.mxu0 %v1776_v63  ;;  %v1810_v47 = vpack.c.bf16 %v205_v4, %v204_v1  ;;  %v1822_v11 = vpack.c.bf16 %v211_v51, %v210_v44  ;;  %v178_v30 = vld [vmem:[#allocation8 + $0xe0] sm:$0xff]  ;;  %v179_v62 = vld [vmem:[#allocation8 + $0xe8] sm:$0xff]  ;;  %v181_v13 = vld [vmem:[#allocation8 + $0xf8] sm:$0xff] }
 0x175   :  { %570 = vrot.lane.b32.xlu1 %v2348_v37, %s2037_s12  ;;  %v2393_v50 = vmul.f32 %v541_v7, %v429_v5  ;;  %v173_v5 = vld [vmem:[#allocation8 + $0xb8] sm:$0xff]  ;;  %v188_v7 = vld [vmem:[#allocation8 + $0x130] sm:$0xff]  ;;  %v194_v63 = vld [vmem:[#allocation8 + $0x160] sm:$0xff]  ;;  %v1790_v1 = vpack.c.bf16 %v179_v62, %v178_v30  ;;  %v876_v62 = vsub.s32 5, %v2162_v39 }
 0x176   :  { %v1778_v58 = vpack.c.bf16 %v173_v5, %v172_v41  ;;  %1811 = vmatprep.subr.bf16.mxu1 %v1810_v47  ;;  %v1812_v14 = vpack.c.bf16 %v189_v46, %v188_v7  ;;  %v195_v4 = vld [vmem:[#allocation8 + $0x168] sm:$0xff]  ;;  %v162_v47 = vld [vmem:[#allocation8 + $0x60] sm:$0xff]  ;;  %v212_v5 = vld [vmem:[#allocation8 + $0x1f0] sm:$0xff] }
 0x177   :  { %611 = vrot.lane.b32.xlu0 %v2342_v32, %s2044_s2  ;;  %v163_v41 = vld [vmem:[#allocation8 + $0x68] sm:$0xff]  ;;  %v213_v7 = vld [vmem:[#allocation8 + $0x1f8] sm:$0xff]  ;;  %v1824_v46 = vpack.c.bf16 %v195_v4, %v194_v63  ;;  %v658_v29 = vld [vmem:[#allocation7] sm:$0xff] }
 0x178   :  { %1779 = vmatprep.subr.bf16.mxu0 %v1778_v58  ;;  %1813 = vmatpush3.bf16.msra.mxu1 %v1812_v14  ;;  %v180_v58 = vld [vmem:[#allocation8 + $0xf0] sm:$0xff]  ;;  %v1792_v10 = vpack.c.bf16 %v163_v41, %v162_v47  ;;  %v197_v17 = vld [vmem:[#allocation8 + $0x178] sm:$0xff]  ;;  %v659_v28 = vld [vmem:[#allocation7 + $0x8] sm:$0xff]  ;;  %v2429_v54 = vrot.slane %v658_v29, %v2174_v43 }
 0x179   :  { %586 = vrot.lane.b32.xlu1 %v2356_v59, %s2037_s12  ;;  %1781 = vmatpush3.bf16.msra.mxu0 %v1780_v15  ;;  %v196_v14 = vld [vmem:[#allocation8 + $0x170] sm:$0xff]  ;;  %v1826_v15 = vpack.c.bf16 %v213_v7, %v212_v5  ;;  %v1794_v16 = vpack.c.bf16 %v181_v13, %v180_v58  ;;  %v661_v52 = vld [vmem:[#allocation7 + $0x18] sm:$0xff]  ;;  %v2417_v34 = vrot.slane %v659_v28, %v2174_v43  ;;  %v922_v63 = vld [vmem:[%s3473_s4] sm:$0xf] }
 0x17a   :  { %1815 = vmatprep.subr.bf16.mxu1 %v1814_v20  ;;  %1783 = vmatprep.subr.bf16.mxu0 %v1782_v22  ;;  %v165_v20 = vld [vmem:[#allocation8 + $0x78] sm:$0xff]  ;;  %v1828_v45 = vpack.c.bf16 %v197_v17, %v196_v14  ;;  %v994_v22 = vsub.s32 7, %v2162_v39  ;;  %v2419_v36 = vrot.slane %v659_v28, %v828_v53  ;;  %v2432_v57 = vrot.slane %v661_v52, %v2174_v43 }
 0x17b   :  { %584 = vrot.lane.b32.xlu0 %v2361_v6, %s2037_s12  ;;  %v1796_v21 = vpack.c.bf16 %v165_v20, %v164_v18  ;;  %v2436_v60 = vrot.slane %v661_v52, %v828_v53  ;;  %v2449_v30 = vrot.slane %v659_v28, %v2177_v0  ;;  %v2493_v13 = vrot.slane %v922_v63, %v2171_v42 }
 0x17c   :  { %1817 = vmatpush3.bf16.msra.mxu1 %v1816_v25  ;;  %v660_v25 = vld [vmem:[#allocation7 + $0x10] sm:$0xff]  ;;  %v2421_v23 = vrot.slane %v659_v28, %v994_v22  ;;  %v2438_v44 = vrot.slane %v658_v29, %v994_v22  ;;  %v2440_v51 = vrot.slane %v661_v52, %v994_v22  ;;  %v2504_v17 = vrot.slane %v658_v29, %v2165_v40 }
 0x17d   :  { %580 = vrot.lane.b32.xlu1 %v2365_v2, %s2037_s12  ;;  %1785 = vmatpush3.bf16.msra.mxu0 %v1784_v31  ;;  %v2414_v31 = vrot.slane %v660_v25, %v2174_v43  ;;  %v2426_v55 = vrot.slane %v660_v25, %v994_v22  ;;  %v2468_v47 = vrot.slane %v660_v25, %v2165_v40 }
 0x17e   :  { %1819 = vmatprep.subr.bf16.mxu1 %v1818_v56  ;;  %1787 = vmatprep.subr.bf16.mxu0 %v1786_v48  ;;  %v2423_v56 = vrot.slane %v660_v25, %v828_v53  ;;  %v962_v48 = vsub.s32 6, %v2162_v39  ;;  %v2465_v4 = vmul.f32 %v2421_v23, %v2268_v19  ;;  %v2477_v7 = vrot.slane %v660_v25, %v2177_v0 }
 0x17f   :  { %619 = vrot.lane.b32.xlu0 %v2327_v12, %s2044_s2  ;;  %v2474_v5 = vmul.f32 %v2414_v31, %v2275_v26  ;;  %3517 = vst [vmem:[#allocation18_spill] sm:$0xff] %v2493_v13  ;;  %v2496_v14 = vrot.slane %v660_v25, %v876_v62  ;;  %v2512_v18 = vmul.f32 %v2432_v57, %v2283_v35 }
 0x180   :  { %1821 = vmatpush3.bf16.msra.mxu1 %v1820_v27  ;;  %v2434_v27 = vrot.slane %v658_v29, %v828_v53  ;;  %v2470_v41 = vrot.slane %v659_v28, %v962_v48  ;;  %3514 = vst [vmem:[#allocation15_spill] sm:$0xff] %v2477_v7  ;;  %v2481_v58 = vmul.f32 %v2423_v56, %v2275_v26 }
 0x181   :  { %631 = vrot.lane.b32.xlu1 %v2365_v2, %s2044_s2  ;;  %1789 = vmatpush3.bf16.msra.mxu0 %v1788_v8  ;;  %v2443_v8 = vand.u32 127, %v216_v38  ;;  %v2461_v38 = vmul.f32 %v2419_v36, %v2268_v19  ;;  %3518 = vst [vmem:[#allocation19_spill] sm:$0xff] %v2496_v14  ;;  %3522 = vst [vmem:[#allocation23_spill] sm:$0xff] %v2512_v18  ;;  %v2515_v20 = vrot.slane %v658_v29, %v2177_v0 }
 0x182   :  { %1823 = vmatprep.subr.bf16.mxu1 %v1822_v11  ;;  %1791 = vmatprep.subr.bf16.mxu0 %v1790_v1  ;;  %v2446_v11 = vrot.slane %v659_v28, %v2165_v40  ;;  %v2457_v1 = vmul.f32 %v2417_v34, %v2268_v19  ;;  %v2487_v19 = vmul.f32 %v2426_v55, %v2275_v26 }
 0x183   :  { %635 = vrot.lane.b32.xlu0 %v2361_v6, %s2044_s2  ;;  %vm592_vm0 = vcmp.lt.s32.totalorder %v2443_v8, 32  ;;  %vm641_vm1 = vcmp.lt.s32.totalorder %v2443_v8, 96  ;;  %v2508_v26 = vrot.slane %v661_v52, %v2165_v40  ;;  %v2524_v53 = vmul.f32 %v2436_v60, %v2283_v35 }
 0x184   :  { %1825 = vmatpush3.bf16.msra.mxu1 %v1824_v46  ;;  %v2483_v46 = vrot.slane %v660_v25, %v962_v48  ;;  %v2527_v22 = vrot.slane %v922_v63, %v2177_v0  ;;  %v2539_v13 = vmul.f32 %v2429_v54, %v2262_v9  ;;  %v2543_v18 = vmul.f32 %v2434_v27, %v2262_v9 }
 0x185   :  { %615 = vrot.lane.b32.xlu1 %v2377_v3, %s2044_s2  ;;  %1793 = vmatpush3.bf16.msra.mxu0 %v1792_v10  ;;  %v2490_v10 = vrot.slane %v660_v25, %v2171_v42  ;;  %3521 = vst [vmem:[#allocation22_spill] sm:$0xff] %v2508_v26  ;;  %v2529_v25 = vrot.slane %v658_v29, %v962_v48 }
 0x186   :  { %1827 = vmatprep.subr.bf16.mxu1 %v1826_v15  ;;  %1795 = vmatprep.subr.bf16.mxu0 %v1794_v16  ;;  %3515 = vst [vmem:[#allocation16_spill] sm:$0xff] %v2483_v46  ;;  %v2499_v15 = vrot.slane %v661_v52, %v2171_v42  ;;  %v2501_v16 = vrot.slane %v661_v52, %v876_v62  ;;  %3524 = vst [vmem:[#allocation25_spill] sm:$0xff] %v2527_v22 }
 0x187   :  { %562 = vrot.lane.b32.xlu0 %v2382_v33, %s2037_s12  ;;  %3516 = vst [vmem:[#allocation17_spill] sm:$0xff] %v2490_v10  ;;  %3526 = vst [vmem:[#allocation27_spill] sm:$0xff] %v2539_v13 }
 0x188   :  { %1829 = vmatpush3.bf16.msra.mxu1 %v1828_v45  ;;  %3519 = vst [vmem:[#allocation20_spill] sm:$0xff] %v2499_v15  ;;  %3520 = vst [vmem:[#allocation21_spill] sm:$0xff] %v2501_v16  ;;  %v2518_v45 = vrot.slane %v661_v52, %v2177_v0  ;;  %v2531_v16 = vrot.slane %v661_v52, %v962_v48  ;;  %v2535_v15 = vmul.f32 %v2440_v51, %v2283_v35 }
 0x189   :  { %572 = vrot.lane.b32.xlu1 %v2387_v49, %s2037_s12  ;;  %1797 = vmatpush3.bf16.msra.mxu0 %v1796_v21  ;;  %3527 = vst [vmem:[#allocation28_spill] sm:$0xff] %v2543_v18  ;;  %v2547_v0 = vmul.f32 %v2438_v44, %v2262_v9  ;;  %v2551_v52 = vmul.f32 %v2414_v31, %v2305_v61 }
 0x18a   :  { %3523 = vst [vmem:[#allocation24_spill] sm:$0xff] %v2518_v45  ;;  %3525 = vst [vmem:[#allocation26_spill] sm:$0xff] %v2535_v15  ;;  %v2555_v35 = vmul.f32 %v2423_v56, %v2305_v61  ;;  %v2559_v48 = vmul.f32 %v2426_v55, %v2305_v61  ;;  %v2562_v15 = vrot.slane %v658_v29, %v2171_v42 }
 0x18b   :  { %564 = vrot.lane.b32.xlu0 %v2377_v3, %s2037_s12  ;;  %3528 = vst [vmem:[#allocation29_spill] sm:$0xff] %v2547_v0  ;;  %3529 = vst [vmem:[#allocation30_spill] sm:$0xff] %v2551_v52  ;;  %v2565_v18 = vrot.slane %v659_v28, %v2171_v42  ;;  %v2567_v9 = vrot.slane %v658_v29, %v876_v62  ;;  %v2569_v0 = vrot.slane %v659_v28, %v876_v62 }
 0x18c   :  { %3530 = vst [vmem:[#allocation31_spill] sm:$0xff] %v2555_v35  ;;  %v2572_v52 = vrot.slane %v922_v63, %v2165_v40  ;;  %v2577_v35 = vrot.slane %v922_v63, %v2174_v43  ;;  %v2581_v61 = vmul.f32 %v2417_v34, %v2327_v12  ;;  %v2585_v42 = vmul.f32 %v2419_v36, %v2327_v12 }
 0x18d   :  { %588 = vrot.lane.b32.xlu1 %v2393_v50, %s2037_s12  ;;  %3531 = vst [vmem:[#allocation32_spill] sm:$0xff] %v2567_v9  ;;  %v2589_v28 = vmul.f32 %v2421_v23, %v2327_v12  ;;  %v2593_v40 = vmul.f32 %v2414_v31, %v2338_v24  ;;  %v2597_v43 = vmul.f32 %v2423_v56, %v2338_v24 }
 0x18e   :  { %v2601_v29 = vmul.f32 %v2426_v55, %v2338_v24  ;;  %v2605_v62 = vmul.f32 %v2432_v57, %v2356_v59  ;;  %v2609_v12 = vmul.f32 %v2436_v60, %v2356_v59 }
 0x18f   :  { %639 = vrot.lane.b32.xlu0 %v2393_v50, %s2044_s2  ;;  %3532 = vst [vmem:[#allocation33_spill] sm:$0xff] %v2593_v40  ;;  %3533 = vst [vmem:[#allocation34_spill] sm:$0xff] %v2597_v43  ;;  %v2613_v40 = vmul.f32 %v2440_v51, %v2356_v59  ;;  %v2617_v43 = vmul.f32 %v2429_v54, %v2342_v32 }
 0x190   :  { %3534 = vst [vmem:[#allocation35_spill] sm:$0xff] %v2601_v29  ;;  %3535 = vst [vmem:[#allocation36_spill] sm:$0xff] %v2605_v62  ;;  %v2625_v62 = vmul.f32 %v2434_v27, %v2342_v32  ;;  %v2629_v29 = vmul.f32 %v2436_v60, %v2361_v6 }
 0x191   :  { %623 = vrot.lane.b32.xlu1 %v2387_v49, %s2044_s2  ;;  %3536 = vst [vmem:[#allocation37_spill] sm:$0xff] %v2609_v12  ;;  %3537 = vst [vmem:[#allocation38_spill] sm:$0xff] %v2613_v40  ;;  %v2637_v40 = vmul.f32 %v2440_v51, %v2361_v6 }
 0x192   :  { %3539 = vst [vmem:[#allocation40_spill] sm:$0xff] %v2625_v62  ;;  %3540 = vst [vmem:[#allocation41_spill] sm:$0xff] %v2629_v29  ;;  %v2646_v62 = vmul.f32 %v2429_v54, %v2382_v33  ;;  %v2650_v29 = vmul.f32 %v2417_v34, %v2348_v37 }
 0x193   :  { %621 = vrot.lane.b32.xlu0 %v2348_v37, %s2044_s2  ;;  %3542 = vst [vmem:[#allocation43_spill] sm:$0xff] %v2637_v40  ;;  %v2661_v40 = vmul.f32 %v2419_v36, %v2348_v37 }
 0x194   :  { %3543 = vst [vmem:[#allocation44_spill] sm:$0xff] %v2646_v62  ;;  %3544 = vst [vmem:[#allocation45_spill] sm:$0xff] %v2650_v29  ;;  %v2669_v62 = vmul.f32 %v2421_v23, %v2348_v37 }
 0x195   :  { %629 = vrot.lane.b32.xlu1 %v2338_v24, %s2044_s2  ;;  %v2621_v24 = vmul.f32 %v2432_v57, %v2361_v6  ;;  %3546 = vst [vmem:[#allocation47_spill] sm:$0xff] %v2661_v40  ;;  %v2682_v40 = vmul.f32 %v2423_v56, %v2365_v2 }
 0x196   :  { %3548 = vst [vmem:[#allocation49_spill] sm:$0xff] %v2669_v62 }
 0x197   :  { %613 = vrot.lane.b32.xlu0 %v2382_v33, %s2044_s2  ;;  %3538 = vst [vmem:[#allocation39_spill] sm:$0xff] %v2621_v24  ;;  %3550 = vst [vmem:[#allocation51_spill] sm:$0xff] %v2682_v40 }
 0x199   :  { %637 = vrot.lane.b32.xlu1 %v2356_v59, %s2044_s2  ;;  %v2633_v59 = vmul.f32 %v2438_v44, %v2342_v32  ;;  %v2654_v32 = vmul.f32 %v2434_v27, %v2382_v33 }
 0x19b   :  { %3541 = vst [vmem:[#allocation42_spill] sm:$0xff] %v2633_v59  ;;  %3545 = vst [vmem:[#allocation46_spill] sm:$0xff] %v2654_v32  ;;  %v2665_v59 = vmul.f32 %v2438_v44, %v2382_v33  ;;  %v2686_v33 = vmul.f32 %v2426_v55, %v2365_v2  ;;  %v2703_v55 = vmul.f32 %v2421_v23, %v2387_v49 }
 0x19c   :  { %v2725_v23 = vmul.f32 %v2436_v60, %v2393_v50 }
 0x19d   :  { %3547 = vst [vmem:[#allocation48_spill] sm:$0xff] %v2665_v59  ;;  %3551 = vst [vmem:[#allocation52_spill] sm:$0xff] %v2686_v33  ;;  %v2692_v59 = vmul.f32 %v2417_v34, %v2387_v49  ;;  %v2705_v33 = vld [vmem:[#allocation7 + $0x30] ss:$0 sm:$0xff] }
 0x19e   :  { %3554 = vst [vmem:[#allocation55_spill] sm:$0xff] %v2703_v55  ;;  %3555 = vst [vmem:[#allocation56_spill] sm:$0xff] %v2705_v33  ;;  %v2729_v55 = vmul.f32 %v2438_v44, %v2377_v3 }
 0x19f   :  { %3552 = vst [vmem:[#allocation53_spill] sm:$0xff] %v2692_v59  ;;  %3559 = vst [vmem:[#allocation60_spill] sm:$0xff] %v2725_v23 }
 0x1a0   :  { %3560 = vst [vmem:[#allocation61_spill] sm:$0xff] %v2729_v55 }
 0x1cd   :  { %v2520_v21 = vpop.permute.xlu0 %558 }
 0x1cf   :  { %v567_v22 = vpop.permute.xlu1 %566 }
 0x1d0   :  { %v601_v6 = vsel %vm592_vm0, %v2520_v21, %v567_v22 }
 0x1d1   :  { %v2574_v13 = vpop.permute.xlu0 %574  ;;  %v811_v56 = vmul.f32 %v2449_v30, %v601_v6 }
 0x1d2   :  { %v597_v12 = vsel %vm592_vm0, %v567_v22, %v2574_v13  ;;  %v2678_v22 = vmul.f32 %v2414_v31, %v2365_v2  ;;  %v2696_v31 = vmul.f32 %v2419_v36, %v2387_v49  ;;  %v2711_v36 = vmul.f32 %v2429_v54, %v2377_v3 }
 0x1d3   :  { %v634_v63 = vpop.permute.xlu1 %633  ;;  %v684_v37 = vmul.f32 %v2468_v47, %v597_v12  ;;  %v812_v62 = vmul.f32 %v2477_v7, %v597_v12  ;;  %v978_v40 = vmul.f32 %v2483_v46, %v597_v12  ;;  %v2721_v49 = vmul.f32 %v2434_v27, %v2377_v3 }
 0x1d4   :  { %3549 = vst [vmem:[#allocation50_spill] sm:$0xff] %v2678_v22  ;;  %3553 = vst [vmem:[#allocation54_spill] sm:$0xff] %v2696_v31  ;;  %v683_v22 = vmul.f32 %v2446_v11, %v601_v6  ;;  %v2715_v31 = vmul.f32 %v2432_v57, %v2393_v50  ;;  %v2733_v54 = vmul.f32 %v2440_v51, %v2393_v50  ;;  %v2739_v27 = vadd.s32 8, %v2162_v39 }
 0x1d5   :  { %v2642_v24 = vpop.permute.xlu0 %625  ;;  %3556 = vst [vmem:[#allocation57_spill] sm:$0xff] %v2711_v36  ;;  %3558 = vst [vmem:[#allocation59_spill] sm:$0xff] %v2721_v49  ;;  %v977_v57 = vmul.f32 %v2470_v41, %v601_v6  ;;  %v732_v36 = vadd.f32 %v2474_v5, %v684_v37  ;;  %v859_v49 = vadd.f32 %v2461_v38, %v811_v56 }
 0x1d6   :  { %v642_v32 = vsel %vm641_vm1, %v2642_v24, %v634_v63  ;;  %3557 = vst [vmem:[#allocation58_spill] sm:$0xff] %v2715_v31  ;;  %3561 = vst [vmem:[#allocation62_spill] sm:$0xff] %v2733_v54  ;;  %v860_v31 = vadd.f32 %v2481_v58, %v812_v62  ;;  %v731_v60 = vadd.f32 %v2457_v1, %v683_v22  ;;  %v3572_v54 = vld [vmem:[#allocation28_spill] sm:$0xff] }
 0x1d7   :  { %v2674_v29 = vpop.permute.xlu1 %576  ;;  %v764_v34 = vmul.f32 %v2490_v10, %v642_v32  ;;  %v892_v59 = vmul.f32 %v2496_v14, %v642_v32  ;;  %3562 = vst [vmem:[#allocation63_spill] sm:$0xff] %v2739_v27  ;;  %v1026_v3 = vadd.f32 %v2487_v19, %v978_v40  ;;  %v1058_v44 = vmul.f32 %v2705_v33, %v642_v32  ;;  %v2759_v32 = vld [vmem:[#allocation7 + $0x38] ss:$0 sm:$0xff]  ;;  %v3569_v27 = vld [vmem:[#allocation21_spill] sm:$0xff]  ;;  %v2788_v33 = vld [vmem:[#allocation7 + $0x28] ss:$0 sm:$0xff] }
 0x1d8   :  { %3564 = vst [vmem:[#allocation65_spill] sm:$0xff] %v2759_v32  ;;  %v3574_v14 = vld [vmem:[#allocation30_spill] sm:$0xff] }
 0x1d9   :  { %v610_v2 = vpop.permute.xlu0 %609  ;;  %v2745_v50 = vadd.f32 %v764_v34, %v732_v36  ;;  %v908_v51 = vadd.f32 %v892_v59, %v860_v31  ;;  %v1025_v59 = vadd.f32 %v2465_v4, %v977_v57  ;;  %v2764_v22 = vadd.f32 %v1058_v44, %v1026_v3  ;;  %v3566_v4 = vld [vmem:[#allocation18_spill] sm:$0xff]  ;;  %v3568_v57 = vld [vmem:[#allocation20_spill] sm:$0xff]  ;;  %v3570_v44 = vld [vmem:[#allocation27_spill] sm:$0xff] }
 0x1da   :  { %v654_v1 = vsel %vm641_vm1, %v634_v63, %v610_v2  ;;  %v3565_v63 = vld [vmem:[#allocation23_spill] sm:$0xff] }
 0x1db   :  { %v2717_v12 = vpop.permute.xlu1 %627  ;;  %3563 = vst [vmem:[#allocation64_spill] sm:$0xff] %v2745_v50  ;;  %v2772_v34 = vadd.f32 %v3566_v4, %v908_v51  ;;  %v1059_v3 = vmul.f32 %v2759_v32, %v654_v1  ;;  %v2786_v50 = vld [vmem:[#allocation7 + $0x20] ss:$0 sm:$0xff] }
 0x1dd   :  { %v583_v55 = vpop.permute.xlu0 %582  ;;  %3567 = vst [vmem:[#allocation23_spill] sm:$0xff] %v2772_v34  ;;  %v3573_v34 = vld [vmem:[#allocation29_spill] sm:$0xff] }
 0x1de   :  { %v593_v5 = vsel %vm592_vm0, %v2574_v13, %v583_v55  ;;  %v605_v58 = vsel %vm592_vm0, %v583_v55, %v2520_v21 }
 0x1df   :  { %v682_v38 = vmul.f32 %v2504_v17, %v605_v58  ;;  %v685_v19 = vmul.f32 %v2508_v26, %v593_v5  ;;  %v813_v40 = vmul.f32 %v2518_v45, %v593_v5  ;;  %v569_v62 = vpop.permute.xlu1 %568  ;;  %v810_v13 = vmul.f32 %v2515_v20, %v605_v58 }
 0x1e0   :  { %v976_v6 = vmul.f32 %v2529_v25, %v605_v58  ;;  %v979_v21 = vmul.f32 %v2531_v16, %v593_v5  ;;  %v598_v56 = vsel %vm592_vm0, %v569_v62, %v2674_v29  ;;  %v765_v58 = vmul.f32 %v3568_v57, %v654_v1 }
 0x1e1   :  { %v733_v37 = vadd.f32 %v3565_v63, %v685_v19  ;;  %v861_v31 = vadd.f32 %v2524_v53, %v813_v40  ;;  %v618_v55 = vpop.permute.xlu0 %617  ;;  %v893_v5 = vmul.f32 %v3569_v27, %v654_v1  ;;  %v730_v19 = vadd.f32 %v3570_v44, %v682_v38  ;;  %v3571_v63 = vld [vmem:[#allocation26_spill] sm:$0xff] }
 0x1e2   :  { %v1027_v53 = vadd.f32 %v3571_v63, %v979_v21  ;;  %v646_v40 = vsel %vm641_vm1, %v618_v55, %v2642_v24  ;;  %v858_v51 = vadd.f32 %v3572_v54, %v810_v13  ;;  %v1024_v4 = vadd.f32 %v3573_v34, %v976_v6 }
 0x1e3   :  { %v579_v23 = vpop.permute.xlu1 %578  ;;  %v688_v36 = vmul.f32 %v2468_v47, %v598_v56  ;;  %v650_v1 = vsel %vm641_vm1, %v610_v2, %v618_v55  ;;  %v2792_v38 = vadd.f32 %v765_v58, %v733_v37  ;;  %v909_v21 = vadd.f32 %v893_v5, %v861_v31 }
 0x1e4   :  { %v816_v44 = vmul.f32 %v2477_v7, %v598_v56  ;;  %v762_v24 = vmul.f32 %v2562_v15, %v650_v1  ;;  %v982_v54 = vmul.f32 %v2483_v46, %v598_v56  ;;  %v763_v13 = vmul.f32 %v2565_v18, %v646_v40 }
 0x1e5   :  { %v561_v63 = vpop.permute.xlu0 %560  ;;  %v890_v6 = vmul.f32 %v2567_v9, %v650_v1  ;;  %v891_v34 = vmul.f32 %v2569_v0, %v646_v40  ;;  %v2800_v32 = vadd.f32 %v1059_v3, %v1027_v53  ;;  %v1056_v2 = vmul.f32 %v2786_v50, %v650_v1 }
 0x1e6   :  { %v1057_v37 = vmul.f32 %v2788_v33, %v646_v40  ;;  %v602_v31 = vsel %vm592_vm0, %v561_v63, %v569_v62  ;;  %v2809_v56 = vadd.f32 %v762_v24, %v730_v19  ;;  %v2812_v57 = vadd.f32 %v3574_v14, %v688_v36  ;;  %v3575_v62 = vld [vmem:[#allocation25_spill] sm:$0xff]  ;;  %v3577_v19 = vld [vmem:[#allocation31_spill] sm:$0xff] }
 0x1e7   :  { %v2806_v55 = vpop.permute.xlu1 %570  ;;  %v906_v5 = vadd.f32 %v890_v6, %v858_v51  ;;  %v907_v27 = vadd.f32 %v891_v34, %v859_v49  ;;  %v2814_v3 = vadd.f32 %v763_v13, %v731_v60  ;;  %v2816_v53 = vadd.f32 %v1056_v2, %v1024_v4 }
 0x1e8   :  { %v687_v40 = vmul.f32 %v2446_v11, %v602_v31  ;;  %v2822_v10 = vadd.f32 %v3575_v62, %v909_v21  ;;  %v2826_v24 = vadd.f32 %v3577_v19, %v816_v44  ;;  %v2828_v49 = vadd.f32 %v1057_v37, %v1025_v59 }
 0x1e9   :  { %v2819_v1 = vpop.permute.xlu0 %611  ;;  %v2832_v60 = vadd.f32 %v2559_v48, %v982_v54  ;;  %v815_v4 = vmul.f32 %v2449_v30, %v602_v31  ;;  %v981_v36 = vmul.f32 %v2470_v41, %v602_v31  ;;  %v2839_v21 = vadd.f32 %v2572_v52, %v906_v5  ;;  %v3582_v48 = vld [vmem:[#allocation34_spill] sm:$0xff] }
 0x1ea   :  { %3576 = vst [vmem:[#allocation27_spill] sm:$0xff] %v2822_v10  ;;  %v2842_v13 = vadd.f32 %v2577_v35, %v907_v27  ;;  %v599_v44 = vsel %vm592_vm0, %v2806_v55, %v579_v23  ;;  %v735_v6 = vadd.f32 %v2581_v61, %v687_v40  ;;  %v3584_v10 = vld [vmem:[#allocation39_spill] sm:$0xff] }
 0x1eb   :  { %v2836_v51 = vpop.permute.xlu1 %586  ;;  %3578 = vst [vmem:[#allocation26_spill] sm:$0xff] %v2839_v21  ;;  %v692_v37 = vmul.f32 %v2468_v47, %v599_v44  ;;  %v820_v31 = vmul.f32 %v2477_v7, %v599_v44  ;;  %v863_v19 = vadd.f32 %v2585_v42, %v815_v4  ;;  %v1029_v14 = vadd.f32 %v2589_v28, %v981_v36  ;;  %v3587_v7 = vld [vmem:[#allocation42_spill] sm:$0xff] }
 0x1ec   :  { %3579 = vst [vmem:[#allocation28_spill] sm:$0xff] %v2842_v13  ;;  %v595_v34 = vsel %vm592_vm0, %v579_v23, %v2836_v51  ;;  %v2863_v61 = vmul.f32 %v2483_v46, %v599_v44 }
 0x1ed   :  { %v585_v2 = vpop.permute.xlu0 %584  ;;  %v2871_v58 = vmul.f32 %v2508_v26, %v595_v34  ;;  %v2874_v27 = vmul.f32 %v2518_v45, %v595_v34  ;;  %v2877_v42 = vmul.f32 %v2531_v16, %v595_v34  ;;  %v2889_v59 = vadd.f32 %v3582_v48, %v820_v31  ;;  %v3586_v48 = vld [vmem:[#allocation41_spill] sm:$0xff] }
 0x1ee   :  { %v594_v5 = vsel %vm592_vm0, %v2674_v29, %v585_v2  ;;  %v606_v23 = vsel %vm592_vm0, %v585_v2, %v561_v63  ;;  %v3580_v2 = vld [vmem:[#allocation33_spill] sm:$0xff] }
 0x1ef   :  { %v2867_v40 = vpop.permute.xlu1 %580  ;;  %v686_v28 = vmul.f32 %v2504_v17, %v606_v23  ;;  %v689_v29 = vmul.f32 %v2508_v26, %v594_v5  ;;  %v814_v63 = vmul.f32 %v2515_v20, %v606_v23  ;;  %v817_v4 = vmul.f32 %v2518_v45, %v594_v5  ;;  %3583 = vst [vmem:[#allocation30_spill] sm:$0xff] %v2889_v59 }
 0x1f0   :  { %v980_v36 = vmul.f32 %v2529_v25, %v606_v23  ;;  %v2886_v54 = vadd.f32 %v3580_v2, %v692_v37  ;;  %v3585_v23 = vld [vmem:[#allocation40_spill] sm:$0xff]  ;;  %v983_v37 = vmul.f32 %v2531_v16, %v594_v5 }
 0x1f1   :  { %v620_v44 = vpop.permute.xlu0 %619  ;;  %v734_v21 = vadd.f32 %v2617_v43, %v686_v28  ;;  %v737_v45 = vadd.f32 %v3584_v10, %v689_v29  ;;  %v862_v26 = vadd.f32 %v3585_v23, %v814_v63  ;;  %v865_v31 = vadd.f32 %v3586_v48, %v817_v4 }
 0x1f2   :  { %3581 = vst [vmem:[#allocation29_spill] sm:$0xff] %v2886_v54  ;;  %v647_v34 = vsel %vm641_vm1, %v620_v44, %v2717_v12  ;;  %v651_v13 = vsel %vm641_vm1, %v2819_v1, %v620_v44  ;;  %v1028_v44 = vadd.f32 %v3587_v7, %v980_v36 }
 0x1f3   :  { %v2901_v2 = vpop.permute.xlu1 %631  ;;  %v766_v59 = vmul.f32 %v2562_v15, %v651_v13  ;;  %v767_v54 = vmul.f32 %v2565_v18, %v647_v34  ;;  %v894_v46 = vmul.f32 %v2567_v9, %v651_v13  ;;  %v895_v43 = vmul.f32 %v2569_v0, %v647_v34 }
 0x1f4   :  { %v1060_v10 = vmul.f32 %v2786_v50, %v651_v13  ;;  %v1061_v28 = vmul.f32 %v2788_v33, %v647_v34 }
 0x1f5   :  { %v636_v29 = vpop.permute.xlu0 %635  ;;  %v2911_v5 = vadd.f32 %v766_v59, %v734_v21  ;;  %v2913_v63 = vadd.f32 %v767_v54, %v735_v6  ;;  %v910_v4 = vadd.f32 %v894_v46, %v862_v26  ;;  %v911_v48 = vadd.f32 %v895_v43, %v863_v19  ;;  %v3592_v26 = vld [vmem:[#allocation17_spill] sm:$0xff]  ;;  %v3593_v19 = vld [vmem:[#allocation20_spill] sm:$0xff] }
 0x1f6   :  { %v643_v23 = vsel %vm641_vm1, %v2717_v12, %v636_v29  ;;  %v2918_v9 = vadd.f32 %v1060_v10, %v1028_v44  ;;  %v2920_v7 = vadd.f32 %v1061_v28, %v1029_v14  ;;  %v655_v13 = vsel %vm641_vm1, %v636_v29, %v2819_v1  ;;  %v3597_v29 = vld [vmem:[#allocation19_spill] sm:$0xff] }
 0x1f7   :  { %3588 = vst [vmem:[#allocation31_spill] sm:$0xff] %v2911_v5  ;;  %3589 = vst [vmem:[#allocation33_spill] sm:$0xff] %v2913_v63  ;;  %v2925_v36 = vpop.permute.xlu1 %615  ;;  %v948_v21 = vadd.f32 %v2572_v52, %v910_v4  ;;  %v3499_v59 = vrot.slane %v2911_v5, 7  ;;  %v3500_v46 = vrot.slane %v2913_v63, 7  ;;  %v768_v54 = vmul.f32 %v3592_v26, %v643_v23 }
 0x1f8   :  { %3590 = vst [vmem:[#allocation34_spill] sm:$0xff] %v2918_v9  ;;  %3591 = vst [vmem:[#allocation39_spill] sm:$0xff] %v2920_v7  ;;  %v949_v12 = vadd.f32 %v2577_v35, %v911_v48  ;;  %v769_v34 = vmul.f32 %v3593_v19, %v655_v13  ;;  %v3594_v1 = vrot.slane %v2809_v56, 7  ;;  %v3595_v43 = vrot.slane %v2814_v3, 7 }
 0x1f9   :  { %v2948_v28 = vadd.f32 %v768_v54, %v2812_v57  ;;  %v896_v4 = vmul.f32 %v3597_v29, %v643_v23  ;;  %v563_v48 = vpop.permute.xlu0 %562  ;;  %v3600_v5 = vrot.slane %v2918_v9, 1  ;;  %v3603_v57 = vrot.slane %v2828_v49, 1 }
 0x1fa   :  { %v1118_v44 = vsel %vm1109_vm2, %v3594_v1, %v3499_v59  ;;  %v1119_v10 = vsel %vm1109_vm2, %v3595_v43, %v3500_v46  ;;  %v3601_v1 = vrot.slane %v2816_v53, 1  ;;  %v3602_v43 = vrot.slane %v2920_v7, 1  ;;  %v3607_v46 = vld [vmem:[#allocation56_spill] sm:$0xff] }
 0x1fb   :  { %3596 = vst [vmem:[#allocation40_spill] sm:$0xff] %v2948_v28  ;;  %v2951_v14 = vadd.f32 %v1118_v44, %v948_v21  ;;  %v2953_v6 = vadd.f32 %v1119_v10, %v949_v12  ;;  %v2971_v21 = vadd.f32 %v769_v34, %v737_v45  ;;  %v3606_v12 = vld [vmem:[#allocation21_spill] sm:$0xff]  ;;  %v912_v10 = vadd.f32 %v896_v4, %v2826_v24  ;;  %v573_v9 = vpop.permute.xlu1 %572  ;;  %v3610_v45 = vld [vmem:[#allocation18_spill] sm:$0xff] }
 0x1fc   :  { %v2961_v59 = vsel %vm1176_vm3, %v3601_v1, %v3600_v5  ;;  %v2969_v54 = vsel %vm1176_vm3, %v3603_v57, %v3602_v43  ;;  %v897_v44 = vmul.f32 %v3606_v12, %v655_v13  ;;  %v3609_v1 = vld [vmem:[#allocation65_spill] sm:$0xff]  ;;  %v3504_v7 = vrot.slane %v2948_v28, 7 }
 0x1fd   :  { %3598 = vst [vmem:[#allocation41_spill] sm:$0xff] %v2951_v14  ;;  %3599 = vst [vmem:[#allocation42_spill] sm:$0xff] %v2953_v6  ;;  %v1062_v14 = vmul.f32 %v3607_v46, %v643_v23  ;;  %v3608_v6 = vld [vmem:[#allocation43_spill] sm:$0xff]  ;;  %v1063_v63 = vmul.f32 %v3609_v1, %v655_v13  ;;  %v607_v43 = vsel %vm592_vm0, %v2836_v51, %v563_v48  ;;  %v3506_v24 = vrot.slane %v2971_v21, 7  ;;  %v3615_v13 = vld [vmem:[#allocation64_spill] sm:$0xff] }
 0x1fe   :  { %3604 = vst [vmem:[#allocation17_spill] sm:$0xff] %v2969_v54  ;;  %3605 = vst [vmem:[#allocation20_spill] sm:$0xff] %v2971_v21  ;;  %v1031_v5 = vadd.f32 %v3608_v6, %v983_v37  ;;  %v913_v57 = vadd.f32 %v897_v44, %v865_v31  ;;  %v950_v34 = vadd.f32 %v3610_v45, %v912_v10  ;;  %v3612_v23 = vld [vmem:[#allocation35_spill] sm:$0xff]  ;;  %v3616_v6 = vrot.slane %v3615_v13, 7  ;;  %v3619_v10 = vld [vmem:[#allocation36_spill] sm:$0xff] }
 0x1ff   :  { %v2984_v54 = vadd.f32 %v1062_v14, %v2832_v60  ;;  %v2989_v4 = vadd.f32 %v3612_v23, %v2863_v61  ;;  %v603_v60 = vsel %vm592_vm0, %v563_v48, %v2806_v55  ;;  %v3617_v61 = vrot.slane %v2792_v38, 7  ;;  %v3621_v23 = vld [vmem:[#allocation37_spill] sm:$0xff]  ;;  %v3632_v21 = vld [vmem:[#allocation16_spill] sm:$0xff] }
 0x200   :  { %v2991_v37 = vadd.f32 %v1063_v63, %v1031_v5  ;;  %v1120_v51 = vsel %vm1109_vm2, %v3616_v6, %v3504_v7  ;;  %v951_v31 = vadd.f32 %v3575_v62, %v913_v57  ;;  %v3014_v5 = vadd.f32 %v3619_v10, %v2871_v58  ;;  %v565_v6 = vpop.permute.xlu0 %564  ;;  %v3625_v10 = vld [vmem:[#allocation38_spill] sm:$0xff]  ;;  %v3642_v62 = vld [vmem:[#allocation52_spill] sm:$0xff] }
 0x201   :  { %3611 = vst [vmem:[#allocation19_spill] sm:$0xff] %v2984_v54  ;;  %3613 = vst [vmem:[#allocation21_spill] sm:$0xff] %v2989_v4  ;;  %v1121_v63 = vsel %vm1109_vm2, %v3617_v61, %v3506_v24  ;;  %v3009_v14 = vadd.f32 %v1120_v51, %v950_v34  ;;  %v3505_v44 = vrot.slane %v2984_v54, 1  ;;  %v3018_v55 = vadd.f32 %v3621_v23, %v2874_v27  ;;  %v589_v61 = vpop.permute.xlu1 %588 }
 0x202   :  { %3614 = vst [vmem:[#allocation56_spill] sm:$0xff] %v2991_v37  ;;  %3620 = vst [vmem:[#allocation65_spill] sm:$0xff] %v3014_v5  ;;  %v3510_v48 = vrot.slane %v2991_v37, 1  ;;  %v690_v57 = vmul.f32 %v2504_v17, %v607_v43  ;;  %v3022_v7 = vadd.f32 %v1121_v63, %v951_v31  ;;  %v3624_v34 = vrot.slane %v2764_v22, 1  ;;  %v3630_v37 = vld [vmem:[#allocation44_spill] sm:$0xff] }
 0x203   :  { %3618 = vst [vmem:[#allocation43_spill] sm:$0xff] %v3009_v14  ;;  %3622 = vst [vmem:[#allocation18_spill] sm:$0xff] %v3018_v55  ;;  %v691_v58 = vmul.f32 %v2446_v11, %v603_v60  ;;  %v818_v27 = vmul.f32 %v2515_v20, %v607_v43  ;;  %v3036_v23 = vadd.f32 %v3625_v10, %v2877_v42  ;;  %v3627_v31 = vrot.slane %v2800_v32, 1  ;;  %v3629_v10 = vld [vmem:[#allocation15_spill] sm:$0xff] }
 0x204   :  { %3623 = vst [vmem:[#allocation35_spill] sm:$0xff] %v3022_v7  ;;  %v3030_v51 = vsel %vm1176_vm3, %v3624_v34, %v3505_v44  ;;  %v819_v34 = vmul.f32 %v2449_v30, %v603_v60  ;;  %v600_v44 = vsel %vm592_vm0, %v573_v9, %v2867_v40  ;;  %v984_v24 = vmul.f32 %v2529_v25, %v607_v43 }
 0x205   :  { %3626 = vst [vmem:[#allocation64_spill] sm:$0xff] %v3036_v23  ;;  %v3044_v63 = vsel %vm1176_vm3, %v3627_v31, %v3510_v48  ;;  %v985_v7 = vmul.f32 %v2470_v41, %v603_v60  ;;  %v696_v42 = vmul.f32 %v2468_v47, %v600_v44  ;;  %v824_v14 = vmul.f32 %v3629_v10, %v600_v44  ;;  %v3633_v23 = vld [vmem:[#allocation45_spill] sm:$0xff]  ;;  %v3634_v60 = vld [vmem:[#allocation46_spill] sm:$0xff] }
 0x206   :  { %3628 = vst [vmem:[#allocation36_spill] sm:$0xff] %v3044_v63  ;;  %v3055_v54 = vadd.f32 %v3630_v37, %v690_v57  ;;  %v990_v31 = vmul.f32 %v3632_v21, %v600_v44  ;;  %v604_v48 = vsel %vm592_vm0, %v565_v6, %v573_v9  ;;  %v596_v28 = vsel %vm592_vm0, %v2867_v40, %v589_v61  ;;  %v3636_v57 = vld [vmem:[#allocation47_spill] sm:$0xff]  ;;  %v3637_v44 = vld [vmem:[#allocation22_spill] sm:$0xff]  ;;  %v3646_v63 = vld [vmem:[#allocation24_spill] sm:$0xff] }
 0x207   :  { %v3064_v43 = vadd.f32 %v3633_v23, %v691_v58  ;;  %v3067_v4 = vadd.f32 %v3634_v60, %v818_v27  ;;  %v695_v47 = vmul.f32 %v2446_v11, %v604_v48  ;;  %v823_v37 = vmul.f32 %v2449_v30, %v604_v48  ;;  %v640_v58 = vpop.permute.xlu0 %639  ;;  %v3638_v23 = vld [vmem:[#allocation48_spill] sm:$0xff]  ;;  %v3639_v60 = vld [vmem:[#allocation49_spill] sm:$0xff]  ;;  %v3640_v30 = vld [vmem:[#allocation50_spill] sm:$0xff] }
 0x208   :  { %3631 = vst [vmem:[#allocation37_spill] sm:$0xff] %v3055_v54  ;;  %v3072_v10 = vadd.f32 %v3636_v57, %v819_v34  ;;  %v989_v21 = vmul.f32 %v2470_v41, %v604_v48  ;;  %v608_v9 = vsel %vm592_vm0, %v589_v61, %v565_v6  ;;  %v697_v40 = vmul.f32 %v3637_v44, %v596_v28  ;;  %v3641_v34 = vld [vmem:[#allocation51_spill] sm:$0xff]  ;;  %v3643_v48 = vld [vmem:[#allocation53_spill] sm:$0xff]  ;;  %v3644_v6 = vld [vmem:[#allocation54_spill] sm:$0xff] }
 0x209   :  { %3635 = vst [vmem:[#allocation38_spill] sm:$0xff] %v3067_v4  ;;  %v3080_v27 = vadd.f32 %v3638_v23, %v984_v24  ;;  %v3083_v11 = vadd.f32 %v3639_v60, %v985_v7  ;;  %v744_v55 = vadd.f32 %v3640_v30, %v696_v42  ;;  %v872_v57 = vadd.f32 %v3641_v34, %v824_v14  ;;  %v3645_v4 = vld [vmem:[#allocation58_spill] sm:$0xff]  ;;  %v624_v42 = vpop.permute.xlu1 %623  ;;  %v3647_v14 = vld [vmem:[#allocation55_spill] sm:$0xff]  ;;  %v3650_v34 = vld [vmem:[#allocation60_spill] sm:$0xff] }
 0x20a   :  { %v1038_v41 = vadd.f32 %v3642_v62, %v990_v31  ;;  %v743_v5 = vadd.f32 %v3643_v48, %v695_v47  ;;  %v871_v61 = vadd.f32 %v3644_v6, %v823_v37  ;;  %v694_v44 = vmul.f32 %v2504_v17, %v608_v9 }
 0x20b   :  { %v745_v54 = vadd.f32 %v3645_v4, %v697_v40  ;;  %v825_v24 = vmul.f32 %v3646_v63, %v596_v28  ;;  %v991_v23 = vmul.f32 %v2531_v16, %v596_v28  ;;  %v645_v7 = vsel %vm641_vm1, %v2901_v2, %v640_v58  ;;  %v3648_v63 = vld [vmem:[#allocation62_spill] sm:$0xff]  ;;  %v3698_v39 = vld [vmem:[#allocation35_spill] sm:$0xff] }
 0x20c   :  { %v1037_v60 = vadd.f32 %v3647_v14, %v989_v21  ;;  %v822_v62 = vmul.f32 %v2515_v20, %v608_v9  ;;  %v657_v31 = vsel %vm641_vm1, %v640_v58, %v2925_v36  ;;  %v776_v17 = vmul.f32 %v3592_v26, %v645_v7  ;;  %v3649_v58 = vld [vmem:[#allocation57_spill] sm:$0xff] }
 0x20d   :  { %v988_v4 = vmul.f32 %v2529_v25, %v608_v9  ;;  %v1039_v47 = vadd.f32 %v3648_v63, %v991_v23  ;;  %v777_v16 = vmul.f32 %v3593_v19, %v657_v31  ;;  %v904_v28 = vmul.f32 %v3597_v29, %v645_v7 }
 0x20e   :  { %v3107_v37 = vadd.f32 %v776_v17, %v744_v55  ;;  %v1070_v21 = vmul.f32 %v3607_v46, %v645_v7  ;;  %v1071_v20 = vmul.f32 %v3609_v1, %v657_v31  ;;  %v649_v40 = vsel %vm641_vm1, %v624_v42, %v2901_v2 }
 0x20f   :  { %v742_v30 = vadd.f32 %v3649_v58, %v694_v44  ;;  %v873_v25 = vadd.f32 %v3650_v34, %v825_v24  ;;  %v3116_v9 = vadd.f32 %v777_v16, %v745_v54  ;;  %v653_v48 = vsel %vm641_vm1, %v2925_v36, %v624_v42 }
 0x210   :  { %v3121_v55 = vadd.f32 %v1070_v21, %v1038_v41  ;;  %v3123_v6 = vadd.f32 %v1071_v20, %v1039_v47  ;;  %v1107_v23 = vrot.slane %v3107_v37, 7  ;;  %v774_v7 = vmul.f32 %v2562_v15, %v653_v48  ;;  %v3653_v47 = vld [vmem:[#allocation32_spill] sm:$0xff]  ;;  %v3654_v20 = vld [vmem:[#allocation23_spill] sm:$0xff]  ;;  %v3671_v8 = vld [vmem:[#allocation38_spill] sm:$0xff] }
 0x211   :  { %v905_v2 = vmul.f32 %v3606_v12, %v657_v31  ;;  %v920_v14 = vadd.f32 %v904_v28, %v872_v57  ;;  %v1108_v44 = vrot.slane %v3116_v9, 7  ;;  %v775_v54 = vmul.f32 %v2565_v18, %v649_v40  ;;  %v622_v28 = vpop.permute.xlu0 %621 }
 0x212   :  { %v3651_v24 = vrot.slane %v3615_v13, 7  ;;  %v3513_v41 = vrot.slane %v3121_v55, 1  ;;  %v1175_v42 = vrot.slane %v3123_v6, 1  ;;  %v3138_v17 = vadd.f32 %v774_v7, %v742_v30  ;;  %v630_v7 = vpop.permute.xlu1 %629 }
 0x213   :  { %v3652_v31 = vrot.slane %v2792_v38, 7  ;;  %v791_v63 = vadd.f32 %v775_v54, %v743_v5  ;;  %v902_v16 = vmul.f32 %v3653_v47, %v653_v48  ;;  %v3655_v30 = vrot.slane %v2764_v22, 1  ;;  %v3657_v54 = vld [vmem:[#allocation59_spill] sm:$0xff] }
 0x214   :  { %v1124_v36 = vsel %vm1109_vm2, %v1107_v23, %v3651_v24  ;;  %v3656_v34 = vrot.slane %v2800_v32, 1  ;;  %v870_v24 = vadd.f32 %v3657_v54, %v822_v62  ;;  %v3659_v22 = vld [vmem:[#allocation27_spill] sm:$0xff]  ;;  %v1068_v32 = vmul.f32 %v2786_v50, %v653_v48 }
 0x215   :  { %v1125_v57 = vsel %vm1109_vm2, %v1108_v44, %v3652_v31  ;;  %v1128_v13 = vsel %vm1091_vm4, %v1124_v36, 0.0  ;;  %v3158_v38 = vsel %vm1176_vm3, %v3513_v41, %v3655_v30  ;;  %v3658_v36 = vld [vmem:[#allocation61_spill] sm:$0xff]  ;;  %v1069_v41 = vmul.f32 %v2788_v33, %v649_v40 }
 0x216   :  { %v1129_v21 = vsel %vm1091_vm4, %v1125_v57, 0.0  ;;  %v1144_v58 = vadd.f32 %v1128_v13, %v3654_v20  ;;  %v3166_v5 = vsel %vm1176_vm3, %v1175_v42, %v3656_v34  ;;  %v1036_v31 = vadd.f32 %v3658_v36, %v988_v4 }
 0x217   :  { %v1145_v57 = vadd.f32 %v1129_v21, %v3659_v22  ;;  %v903_v13 = vmul.f32 %v2569_v0, %v649_v40  ;;  %v3172_v20 = vadd.f32 %v905_v2, %v873_v25  ;;  %v3180_v34 = vadd.f32 %v3610_v45, %v920_v14  ;;  %v3662_v22 = vld [vmem:[#allocation63_spill] sm:$0xff] }
 0x218   :  { %v3175_v30 = vadd.f32 %v3030_v51, %v1144_v58  ;;  %v1105_v62 = vrot.slane %v3138_v17, 7  ;;  %v1106_v54 = vrot.slane %v791_v63, 7  ;;  %v648_v4 = vsel %vm641_vm1, %v622_v28, %v630_v7  ;;  %v614_v63 = vpop.permute.xlu0 %613 }
 0x219   :  { %v918_v21 = vadd.f32 %v902_v16, %v870_v24  ;;  %v1084_v36 = vadd.f32 %v1068_v32, %v1036_v31  ;;  %v1085_v25 = vadd.f32 %v1069_v41, %v1037_v60  ;;  %v771_v2 = vmul.f32 %v2565_v18, %v648_v4  ;;  %v3663_v41 = vld [vmem:[#allocation26_spill] sm:$0xff]  ;;  %v3664_v24 = vld [vmem:[#allocation28_spill] sm:$0xff] }
 0x21a   :  { %v919_v51 = vadd.f32 %v903_v13, %v871_v61  ;;  %v3660_v58 = vrot.slane %v2809_v56, 7  ;;  %v3661_v48 = vrot.slane %v2814_v3, 7  ;;  %v899_v17 = vmul.f32 %v2569_v0, %v648_v4 }
 0x21b   :  { %vm1159_vm5 = vcmp.lt.s32.totalorder %v3662_v22, 15  ;;  %v1172_v56 = vrot.slane %v1084_v36, 1  ;;  %v1173_v61 = vrot.slane %v1085_v25, 1  ;;  %v787_v31 = vadd.f32 %v771_v2, %v3064_v43  ;;  %v638_v43 = vpop.permute.xlu1 %637 }
 0x21c   :  { %v1122_v40 = vsel %vm1109_vm2, %v1105_v62, %v3660_v58  ;;  %v1123_v14 = vsel %vm1109_vm2, %v1106_v54, %v3661_v48  ;;  %v915_v0 = vadd.f32 %v899_v17, %v3072_v10  ;;  %v3665_v13 = vrot.slane %v2816_v53, 1 }
 0x21d   :  { %v1126_v60 = vsel %vm1091_vm4, %v1122_v40, 0.0  ;;  %v1127_v18 = vsel %vm1091_vm4, %v1123_v14, 0.0  ;;  %v3666_v58 = vrot.slane %v2828_v49, 1  ;;  %v1065_v25 = vmul.f32 %v2788_v33, %v648_v4 }
 0x21e   :  { %v1142_v16 = vadd.f32 %v1126_v60, %v3663_v41  ;;  %v3202_v3 = vadd.f32 %v1127_v18, %v3664_v24  ;;  %v3210_v32 = vsel %vm1176_vm3, %v1172_v56, %v3665_v13  ;;  %v652_v40 = vsel %vm641_vm1, %v614_v63, %v622_v28  ;;  %v3670_v18 = vld [vmem:[#allocation37_spill] sm:$0xff]  ;;  %v3672_v24 = vld [vmem:[#allocation39_spill] sm:$0xff] }
 0x21f   :  { %v3216_v36 = vsel %vm1176_vm3, %v1173_v61, %v3666_v58  ;;  %v956_v10 = vadd.f32 %v2572_v52, %v918_v21  ;;  %v957_v53 = vadd.f32 %v2577_v35, %v919_v51  ;;  %v953_v48 = vadd.f32 %v2577_v35, %v915_v0  ;;  %v3667_v51 = vld [vmem:[#allocation36_spill] sm:$0xff] }
 0x220   :  { %v3224_v2 = vadd.f32 %v2961_v59, %v1142_v16  ;;  %v1081_v49 = vadd.f32 %v1065_v25, %v3083_v11  ;;  %v1102_v14 = vrot.slane %v787_v31, 7  ;;  %v770_v17 = vmul.f32 %v2562_v15, %v652_v40  ;;  %v3668_v11 = vld [vmem:[#allocation33_spill] sm:$0xff] }
 0x221   :  { %v898_v33 = vmul.f32 %v3653_v47, %v652_v40  ;;  %v1064_v4 = vmul.f32 %v2786_v50, %v652_v40  ;;  %v644_v28 = vsel %vm641_vm1, %v630_v7, %v638_v43  ;;  %v656_v21 = vsel %vm641_vm1, %v638_v43, %v614_v63 }
 0x222   :  { %v3236_v59 = vadd.f32 %v3667_v51, %v1145_v57  ;;  %v1111_v35 = vsel %vm1109_vm2, %v1102_v14, %v1106_v54  ;;  %v3669_v60 = vrot.slane %v3668_v11, 7  ;;  %v1169_v47 = vrot.slane %v1081_v49, 1  ;;  %v3675_v49 = vld [vmem:[#allocation31_spill] sm:$0xff] }
 0x223   :  { %v786_v50 = vadd.f32 %v770_v17, %v3670_v18  ;;  %v3247_v41 = vadd.f32 %v1111_v35, %v957_v53  ;;  %v914_v63 = vadd.f32 %v898_v33, %v3671_v8  ;;  %v1080_v57 = vadd.f32 %v1064_v4, %v3080_v27  ;;  %v3674_v53 = vld [vmem:[#allocation42_spill] sm:$0xff]  ;;  %v3680_v18 = vld [vmem:[#allocation41_spill] sm:$0xff] }
 0x224   :  { %v1115_v15 = vsel %vm1109_vm2, %v3669_v60, %v1102_v14  ;;  %v1178_v54 = vsel %vm1176_vm3, %v1169_v47, %v1173_v61  ;;  %v3673_v31 = vrot.slane %v3672_v24, 1  ;;  %v772_v43 = vmul.f32 %v3592_v26, %v644_v28  ;;  %v3677_v4 = vld [vmem:[#allocation34_spill] sm:$0xff] }
 0x225   :  { %v1135_v7 = vsel %vm1091_vm4, %v1115_v15, 0.0  ;;  %v1101_v13 = vrot.slane %v786_v50, 7  ;;  %v952_v25 = vadd.f32 %v2572_v52, %v914_v63  ;;  %v1168_v40 = vrot.slane %v1080_v57, 1  ;;  %v3679_v15 = vld [vmem:[#allocation29_spill] sm:$0xff] }
 0x226   :  { %v1151_v16 = vadd.f32 %v1135_v7, %v953_v48  ;;  %v1182_v0 = vsel %vm1176_vm3, %v3673_v31, %v1169_v47  ;;  %v3676_v14 = vrot.slane %v3675_v49, 7  ;;  %v3678_v51 = vrot.slane %v3677_v4, 1  ;;  %v3681_v63 = vld [vmem:[#allocation65_spill] sm:$0xff]  ;;  %v3683_v31 = vld [vmem:[#allocation30_spill] sm:$0xff] }
 0x227   :  { %v1198_v58 = vsel %vm1159_vm5, %v1182_v0, 0.0  ;;  %v1110_v61 = vsel %vm1109_vm2, %v1101_v13, %v1105_v62  ;;  %v1177_v26 = vsel %vm1176_vm3, %v1168_v40, %v1172_v56  ;;  %v773_v60 = vmul.f32 %v3593_v19, %v656_v21  ;;  %v3682_v19 = vld [vmem:[#allocation25_spill] sm:$0xff] }
 0x228   :  { %v3262_v27 = vadd.f32 %v1198_v58, %v3674_v53  ;;  %v3264_v48 = vadd.f32 %v1178_v54, %v1151_v16  ;;  %v1114_v17 = vsel %vm1109_vm2, %v3676_v14, %v1101_v13  ;;  %v3274_v52 = vadd.f32 %v1110_v61, %v956_v10  ;;  %v3684_v13 = vld [vmem:[#allocation18_spill] sm:$0xff] }
 0x229   :  { %v1134_v33 = vsel %vm1091_vm4, %v1114_v17, 0.0  ;;  %v1181_v35 = vsel %vm1176_vm3, %v3678_v51, %v1168_v40  ;;  %v788_v47 = vadd.f32 %v772_v43, %v3679_v15  ;;  %v900_v10 = vmul.f32 %v3597_v29, %v644_v28  ;;  %v3686_v40 = vld [vmem:[#allocation64_spill] sm:$0xff] }
 0x22a   :  { %v1150_v11 = vadd.f32 %v1134_v33, %v952_v25  ;;  %v1197_v62 = vsel %vm1159_vm5, %v1181_v35, 0.0  ;;  %v901_v56 = vmul.f32 %v3606_v12, %v656_v21  ;;  %v1066_v7 = vmul.f32 %v3607_v46, %v644_v28  ;;  %v3685_v25 = vld [vmem:[#allocation21_spill] sm:$0xff]  ;;  %v3687_v28 = vld [vmem:[#allocation40_spill] sm:$0xff] }
 0x22b   :  { %v3287_v50 = vadd.f32 %v1197_v62, %v3680_v18  ;;  %v789_v57 = vadd.f32 %v773_v60, %v3681_v63  ;;  %v1067_v16 = vmul.f32 %v3609_v1, %v656_v21  ;;  %v1103_v54 = vrot.slane %v788_v47, 7  ;;  %v3694_v15 = vld [vmem:[#allocation56_spill] sm:$0xff] }
 0x22c   :  { %v3292_v8 = vadd.f32 %v1177_v26, %v1150_v11  ;;  %v959_v24 = vadd.f32 %v3682_v19, %v3172_v20  ;;  %v916_v0 = vadd.f32 %v900_v10, %v3683_v31  ;;  %v917_v58 = vadd.f32 %v901_v56, %v3684_v13  ;;  %v3692_v11 = vld [vmem:[#allocation19_spill] sm:$0xff] }
 0x22d   :  { %v1082_v29 = vadd.f32 %v1066_v7, %v3685_v25  ;;  %v1083_v12 = vadd.f32 %v1067_v16, %v3686_v40  ;;  %v1104_v43 = vrot.slane %v789_v57, 7  ;;  %v1112_v46 = vsel %vm1109_vm2, %v1103_v54, %v1107_v23  ;;  %v3689_v23 = vld [vmem:[#allocation20_spill] sm:$0xff]  ;;  %v3696_v56 = vld [vmem:[#allocation43_spill] sm:$0xff]  ;;  %v3697_v57 = vld [vmem:[#allocation17_spill] sm:$0xff] }
 0x22e   :  { %v3688_v1 = vrot.slane %v3687_v28, 7  ;;  %v954_v20 = vadd.f32 %v3610_v45, %v916_v0  ;;  %v955_v53 = vadd.f32 %v3682_v19, %v917_v58  ;;  %v3315_v49 = vadd.f32 %v1112_v46, %v3180_v34 }
 0x22f   :  { %v1113_v37 = vsel %vm1109_vm2, %v1104_v43, %v1108_v44  ;;  %v3690_v14 = vrot.slane %v3689_v23, 7  ;;  %v1170_v33 = vrot.slane %v1082_v29, 1  ;;  %v1171_v45 = vrot.slane %v1083_v12, 1 }
 0x230   :  { %v1116_v21 = vsel %vm1109_vm2, %v3688_v1, %v1103_v54  ;;  %v3327_v51 = vadd.f32 %v1113_v37, %v959_v24  ;;  %v3691_v35 = vrot.slane %v3121_v55, 1  ;;  %v3693_v62 = vrot.slane %v3692_v11, 1 }
 0x231   :  { %v1136_v61 = vsel %vm1091_vm4, %v1116_v21, 0.0  ;;  %v1117_v17 = vsel %vm1109_vm2, %v3690_v14, %v1104_v43  ;;  %v1180_v44 = vsel %vm1176_vm3, %v1171_v45, %v1175_v42  ;;  %v3695_v47 = vrot.slane %v3694_v15, 1 }
 0x232   :  { %v1137_v26 = vsel %vm1091_vm4, %v1117_v17, 0.0  ;;  %v1152_v4 = vadd.f32 %v1136_v61, %v954_v20  ;;  %v1179_v9 = vsel %vm1176_vm3, %v1170_v33, %v3691_v35  ;;  %v1183_v60 = vsel %vm1176_vm3, %v3693_v62, %v1170_v33 }
 0x233   :  { %v1153_v34 = vadd.f32 %v1137_v26, %v955_v53  ;;  %v1184_v18 = vsel %vm1176_vm3, %v3695_v47, %v1171_v45  ;;  %v1199_v55 = vsel %vm1159_vm5, %v1183_v60, 0.0  ;;  %v1260_v6 = vmul.f32 0.044715, %v3236_v59 }
 0x234   :  { %v3347_v10 = vadd.f32 %v1179_v9, %v1152_v4  ;;  %v1200_v42 = vsel %vm1159_vm5, %v1184_v18, 0.0  ;;  %v3353_v7 = vadd.f32 %v1199_v55, %v3696_v56  ;;  %v1210_v16 = vadd.f32 %v3697_v57, %v3202_v3 }
 0x235   :  { %v3355_v63 = vadd.f32 %v1180_v44, %v1153_v34  ;;  %v3360_v54 = vadd.f32 %v1200_v42, %v3698_v39  ;;  %v1276_v19 = vmul.f32 %v1260_v6, %v3236_v59  ;;  %v3366_v24 = vsel %vm1159_vm5, %v3166_v5, 0.0 }
 0x236   :  { %v3371_v31 = vsel %vm1159_vm5, %v3210_v32, 0.0  ;;  %v1258_v0 = vmul.f32 0.044715, %v1210_v16  ;;  %v1206_v3 = vsel %vm1159_vm5, %v3216_v36, 0.0  ;;  %v1244_v13 = vmul.f32 0.7978846, %v3236_v59 }
 0x237   :  { %v1292_v58 = vadd.f32 1.0, %v1276_v19  ;;  %v1259_v25 = vmul.f32 0.044715, %v3175_v30  ;;  %v3379_v29 = vmul.f32 0.5, %v3236_v59  ;;  %v1257_v40 = vmul.f32 0.044715, %v3224_v2 }
 0x238   :  { %v1274_v5 = vmul.f32 %v1258_v0, %v1210_v16  ;;  %v1262_v12 = vmul.f32 0.044715, %v3262_v27  ;;  %v1242_v43 = vmul.f32 0.7978846, %v1210_v16  ;;  %v1243_v46 = vmul.f32 0.7978846, %v3175_v30 }
 0x239   :  { %v1308_v32 = vmul.f32 %v1292_v58, %v1244_v13  ;;  %v1275_v28 = vmul.f32 %v1259_v25, %v3175_v30  ;;  %v1273_v1 = vmul.f32 %v1257_v40, %v3224_v2  ;;  %v1261_v20 = vmul.f32 0.044715, %v3287_v50 }
 0x23a   :  { %v1290_v36 = vadd.f32 1.0, %v1274_v5  ;;  %v1278_v21 = vmul.f32 %v1262_v12, %v3262_v27  ;;  %v1241_v53 = vmul.f32 0.7978846, %v3224_v2  ;;  %v1246_v61 = vmul.f32 0.7978846, %v3262_v27 }
 0x23b   :  { %1873 = vtanh.f32 %v1308_v32  ;;  %v1291_v59 = vadd.f32 1.0, %v1275_v28  ;;  %v1289_v23 = vadd.f32 1.0, %v1273_v1  ;;  %v1277_v17 = vmul.f32 %v1261_v20, %v3287_v50 }
 0x23c   :  { %v1306_v37 = vmul.f32 %v1290_v36, %v1242_v43  ;;  %v1294_v14 = vadd.f32 1.0, %v1278_v21  ;;  %v3392_v33 = vmul.f32 0.5, %v3175_v30  ;;  %v1245_v26 = vmul.f32 0.7978846, %v3287_v50 }
 0x23d   :  { %v1307_v45 = vmul.f32 %v1291_v59, %v1243_v46  ;;  %v1266_v4 = vmul.f32 0.044715, %v3264_v48  ;;  %v1305_v34 = vmul.f32 %v1289_v23, %v1241_v53  ;;  %v1293_v9 = vadd.f32 1.0, %v1277_v17 }
 0x23e   :  { %1875 = vtanh.f32 %v1306_v37  ;;  %v1310_v35 = vmul.f32 %v1294_v14, %v1246_v61  ;;  %v1226_v44 = vmul.f32 0.5, %v1210_v16  ;;  %v1264_v62 = vmul.f32 0.044715, %v3360_v54 }
 0x23f   :  { %1877 = vtanh.f32 %v1307_v45  ;;  %v1282_v11 = vmul.f32 %v1266_v4, %v3264_v48  ;;  %v1225_v60 = vmul.f32 0.5, %v3224_v2  ;;  %v1309_v30 = vmul.f32 %v1293_v9, %v1245_v26 }
 0x240   :  { %1879 = vtanh.f32 %v1305_v34  ;;  %v1263_v15 = vmul.f32 0.044715, %v3353_v7  ;;  %v1250_v47 = vmul.f32 0.7978846, %v3264_v48  ;;  %v1280_v55 = vmul.f32 %v1264_v62, %v3360_v54 }
 0x241   :  { %1881 = vtanh.f32 %v1310_v35  ;;  %v1298_v18 = vadd.f32 1.0, %v1282_v11  ;;  %v1230_v6 = vmul.f32 0.5, %v3262_v27  ;;  %v1268_v56 = vmul.f32 0.044715, %v3355_v63 }
 0x242   :  { %1883 = vtanh.f32 %v1309_v30  ;;  %v1279_v42 = vmul.f32 %v1263_v15, %v3353_v7  ;;  %v1248_v2 = vmul.f32 0.7978846, %v3360_v54  ;;  %v1296_v16 = vadd.f32 1.0, %v1280_v55 }
 0x243   :  { %v1314_v57 = vmul.f32 %v1298_v18, %v1250_v47  ;;  %v1247_v39 = vmul.f32 0.7978846, %v3353_v7  ;;  %v1284_v0 = vmul.f32 %v1268_v56, %v3355_v63  ;;  %v1265_v13 = vmul.f32 0.044715, %v3292_v8 }
 0x244   :  { %v1295_v19 = vadd.f32 1.0, %v1279_v42  ;;  %v3410_v58 = vadd.f32 %v1206_v3, %v3247_v41  ;;  %v1229_v25 = vmul.f32 0.5, %v3287_v50  ;;  %v1312_v5 = vmul.f32 %v1296_v16, %v1248_v2 }
 0x245   :  { %v1874_v27 = vpop.eup %1873  ;;  %1885 = vtanh.f32 %v1314_v57  ;;  %v1252_v40 = vmul.f32 0.7978846, %v3355_v63  ;;  %v1300_v43 = vadd.f32 1.0, %v1284_v0  ;;  %v1281_v46 = vmul.f32 %v1265_v13, %v3292_v8 }
 0x246   :  { %v1340_v12 = vadd.f32 1.0, %v1874_v27  ;;  %v1311_v32 = vmul.f32 %v1295_v19, %v1247_v39  ;;  %1887 = vtanh.f32 %v1312_v5  ;;  %v1249_v28 = vmul.f32 0.7978846, %v3292_v8 }
 0x247   :  { %v1254_v36 = vmul.f32 0.7978846, %v3410_v58  ;;  %v1270_v41 = vmul.f32 0.044715, %v3410_v58  ;;  %v1316_v50 = vmul.f32 %v1300_v43, %v1252_v40  ;;  %v1297_v21 = vadd.f32 1.0, %v1281_v46 }
 0x248   :  { %v1876_v3 = vpop.eup %1875  ;;  %v1356_v1 = vmul.f32 %v1340_v12, %v3379_v29  ;;  %1889 = vtanh.f32 %v1311_v32  ;;  %v1267_v61 = vmul.f32 0.044715, %v3347_v10  ;;  %v3423_v37 = vadd.f32 %v3366_v24, %v3327_v51 }
 0x249   :  { %v1878_v20 = vpop.eup %1877  ;;  %v1338_v59 = vadd.f32 1.0, %v1876_v3  ;;  %v1286_v53 = vmul.f32 %v1270_v41, %v3410_v58  ;;  %1891 = vtanh.f32 %v1316_v50  ;;  %v1313_v17 = vmul.f32 %v1297_v21, %v1249_v28 }
 0x24a   :  { %v1880_v23 = vpop.eup %1879  ;;  %1525 = vmatprep.mubr.f32.mxu1 %v1356_v1  ;;  %v1339_v14 = vadd.f32 1.0, %v1878_v20  ;;  %v3427_v29 = vadd.f32 %v3371_v31, %v3274_v52  ;;  %v1283_v35 = vmul.f32 %v1267_v61, %v3347_v10  ;;  %v1251_v24 = vmul.f32 0.7978846, %v3347_v10 }
 0x24b   :  { %v1882_v45 = vpop.eup %1881  ;;  %v1354_v26 = vmul.f32 %v1338_v59, %v1226_v44  ;;  %v1337_v4 = vadd.f32 1.0, %v1880_v23  ;;  %v1302_v34 = vadd.f32 1.0, %v1286_v53  ;;  %1893 = vtanh.f32 %v1313_v17 }
 0x24c   :  { %v1884_v9 = vpop.eup %1883  ;;  %v1355_v11 = vmul.f32 %v1339_v14, %v3392_v33  ;;  %v1342_v51 = vadd.f32 1.0, %v1882_v45  ;;  %v1299_v47 = vadd.f32 1.0, %v1283_v35  ;;  %v1207_v52 = vsel %vm1159_vm5, %v3158_v38, 0.0 }
 0x24d   :  { %1440 = vmatprep.mubr.f32.mxu0 %v1354_v26  ;;  %v1353_v62 = vmul.f32 %v1337_v4, %v1225_v60  ;;  %v1341_v30 = vadd.f32 1.0, %v1884_v9  ;;  %v1318_v15 = vmul.f32 %v1302_v34, %v1254_v36  ;;  %v1272_v44 = vmul.f32 0.044715, %v3423_v37 }
 0x24e   :  { %1526 = vmatmul.mubr.f32.vlgmr.msra.gmra.mrb[8].mxu1 %v1355_v11  ;;  %v1358_v31 = vmul.f32 %v1342_v51, %v1230_v6  ;;  %v1234_v55 = vmul.f32 0.5, %v3264_v48  ;;  %v1315_v42 = vmul.f32 %v1299_v47, %v1251_v24  ;;  %v1269_v57 = vmul.f32 0.044715, %v3427_v29 }
 0x24f   :  { %v1886_v18 = vpop.eup %1885  ;;  %1441 = vmatmul.mubr.f32.vlgmr.msra.gmra.mrb[8].mxu0 %v1353_v62  ;;  %v1357_v33 = vmul.f32 %v1341_v30, %v1229_v25  ;;  %1895 = vtanh.f32 %v1318_v15  ;;  %v1288_v56 = vmul.f32 %v1272_v44, %v3423_v37  ;;  %v1223_v22 = vadd.f32 %v1207_v52, %v3315_v49 }
 0x250   :  { %1445 = vmatprep.mubr.f32.mxu0 %v1358_v31  ;;  %v1346_v60 = vadd.f32 1.0, %v1886_v18  ;;  %v1888_v38 = vpop.eup %1887  ;;  %v1232_v6 = vmul.f32 0.5, %v3360_v54  ;;  %1897 = vtanh.f32 %v1315_v42  ;;  %v1256_v2 = vmul.f32 0.7978846, %v3423_v37 }
 0x251   :  { %v1344_v19 = vadd.f32 1.0, %v1888_v38  ;;  %v1304_v48 = vadd.f32 1.0, %v1288_v56  ;;  %v1285_v0 = vmul.f32 %v1269_v57, %v3427_v29  ;;  %v1231_v13 = vmul.f32 0.5, %v3353_v7  ;;  %v1913_v56 = vld [vmem:[#allocation2] sm:$0xff] }
 0x252   :  { %v1890_v16 = vpop.eup %1889  ;;  %v1362_v39 = vmul.f32 %v1346_v60, %v1234_v55  ;;  %v1271_v25 = vmul.f32 0.044715, %v1223_v22  ;;  %v1253_v54 = vmul.f32 0.7978846, %v3427_v29  ;;  %v1236_v43 = vmul.f32 0.5, %v3355_v63 }
 0x253   :  { %1446 = vmatmul.mubr.f32.gmra.mrb[10].mxu0 %v1357_v33  ;;  %v1343_v27 = vadd.f32 1.0, %v1890_v16  ;;  %v1892_v5 = vpop.eup %1891  ;;  %v1360_v49 = vmul.f32 %v1344_v19, %v1232_v6  ;;  %v1320_v40 = vmul.f32 %v1304_v48, %v1256_v2  ;;  %v1301_v12 = vadd.f32 1.0, %v1285_v0 }
 0x254   :  { %1450 = vmatprep.mubr.f32.mxu0 %v1362_v39  ;;  %v1348_v46 = vadd.f32 1.0, %v1892_v5  ;;  %v1287_v28 = vmul.f32 %v1271_v25, %v1223_v22  ;;  %v1233_v41 = vmul.f32 0.5, %v3292_v8  ;;  %v1255_v50 = vmul.f32 0.7978846, %v1223_v22 }
 0x255   :  { %v1359_v32 = vmul.f32 %v1343_v27, %v1231_v13  ;;  %v1894_v36 = vpop.eup %1893  ;;  %1530 = vmatprep.mubr.f32.mxu1 %v1360_v49  ;;  %1899 = vtanh.f32 %v1320_v40  ;;  %v1317_v7 = vmul.f32 %v1301_v12, %v1253_v54  ;;  %v1238_v63 = vmul.f32 0.5, %v3410_v58  ;;  %v1914_v27 = vld [vmem:[#allocation2 + $0x8] sm:$0xff] }
 0x256   :  { %v1364_v3 = vmul.f32 %v1348_v46, %v1236_v43  ;;  %v1345_v1 = vadd.f32 1.0, %v1894_v36  ;;  %v1303_v21 = vadd.f32 1.0, %v1287_v28  ;;  %v1235_v8 = vmul.f32 0.5, %v3347_v10 }
 0x257   :  { %1531 = vmatmul.mubr.f32.gmra.mrb[10].mxu1 %v1359_v32  ;;  %1901 = vtanh.f32 %v1317_v7  ;;  %v1240_v4 = vmul.f32 0.5, %v3423_v37  ;;  %v1237_v11 = vmul.f32 0.5, %v3427_v29  ;;  %v1239_v62 = vmul.f32 0.5, %v1223_v22  ;;  %v1613_v37 = vld [vmem:[%s3475_s6] ss:$0 sm:$0xff]  ;;  %s2045_s6 = smov [#allocation10]  }
 0x258   :  { %1535 = vmatprep.mubr.f32.mxu1 %v1364_v3  ;;  %v1361_v59 = vmul.f32 %v1345_v1, %v1233_v41  ;;  %v1319_v53 = vmul.f32 %v1303_v21, %v1255_v50  ;;  %v1915_v1 = vld [vmem:[#allocation2 + $0x10] sm:$0xff]  ;;  %s1595_s9 = sshll.u32 %s2045_s6, 4  ;;  %s1596_s9 = int_to_ptr.vmem [resolvable:$true] %s1595_s9 }
 0x259   :  { %v1896_v20 = vpop.eup %1895  ;;  %s2005_s10 = scalar_lea.vmem %s1596_s9, 512  ;;  %p2010_p5 = scmp.lt.s32.totalorder %s1596_s9, %s1596_s9 }
 0x25a   :  { %v1350_v61 = vadd.f32 1.0, %v1896_v20  ;;  %v1898_v23 = vpop.eup %1897  ;;  %1451 = vmatmul.mubr.f32.gmra.mrb[12].mxu0 %v1361_v59  ;;  %1903 = vtanh.f32 %v1319_v53  ;;  %p2006_p4 = scmp.ne.s32.totalorder %s1596_s9, %s2005_s10  ;;  %p2011_p6 = scmp.lt.s32.totalorder %s2005_s10, %s2005_s10 }
 0x25b   :  { %v1347_v17 = vadd.f32 1.0, %v1898_v23 }
 0x25c   :  { %v1366_v14 = vmul.f32 %v1350_v61, %v1238_v63  ;;  %p2012_p7 = por %p2011_p6, %p2010_p5 }
 0x25d   :  { %v1363_v45 = vmul.f32 %v1347_v17, %v1235_v8 }
 0x25e   :  { %1455 = vmatprep.mubr.f32.mxu0 %v1366_v14  ;;  %p2013_p8 = pnand %p2012_p7, %p2006_p4 }
 0x25f   :  { %v1900_v26 = vpop.eup %1899  ;;  %1536 = vmatmul.mubr.f32.gmra.mrb[12].mxu1 %v1363_v45 }
 0x260   :  { %v1352_v34 = vadd.f32 1.0, %v1900_v26 }
 0x261   :  { %v1902_v35 = vpop.eup %1901 }
 0x262   :  { %v1368_v9 = vmul.f32 %v1352_v34, %v1240_v4  ;;  %v1349_v58 = vadd.f32 1.0, %v1902_v35 }
 0x264   :  { %v1904_v51 = vpop.eup %1903  ;;  %1540 = vmatprep.mubr.f32.mxu1 %v1368_v9  ;;  %v1365_v24 = vmul.f32 %v1349_v58, %v1237_v11  ;;  %v1916_v58 = vld [vmem:[#allocation2 + $0x18] sm:$0xff] }
 0x265   :  { %v1351_v30 = vadd.f32 1.0, %v1904_v51 }
 0x266   :  { %1456 = vmatmul.mubr.f32.gmra.mrb[14].mxu0 %v1365_v24 }
 0x267   :  { %v1367_v10 = vmul.f32 %v1351_v30, %v1239_v62 }
 0x269   :  { %1541 = vmatmul.mubr.f32.gmra.mrb[14].mxu1 %v1367_v10 }
 0x321   :  { %v1690_v15 = vpop.f32.mrb[8].mxu1 }
 0x322   :  { %v1646_v47 = vpop.f32.mrb[8].mxu0  ;;  %v1691_v52 = vpop.f32.mrb[9].mxu1 }
 0x323   :  { %v1692_v31 = vadd.f32 %v1691_v52, %v1690_v15  ;;  %v1647_v44 = vpop.f32.mrb[9].mxu0 }
 0x324   :  { %v1648_v18 = vadd.f32 %v1647_v44, %v1646_v47 }
 0x326   :  { %v1443_v29 = vadd.f32 %v1648_v18, %v1613_v37  ;;  %v1649_v33 = vpop.f32.mrb[10].mxu0 }
 0x327   :  { %v1650_v55 = vpop.f32.mrb[11].mxu0 }
 0x328   :  { %v1528_v42 = vadd.f32 %v1692_v31, %v1443_v29  ;;  %v1651_v60 = vadd.f32 %v1650_v55, %v1649_v33 }
 0x32a   :  { %v1546_v57 = vadd.f32 %v1913_v56, %v1528_v42  ;;  %v1448_v22 = vadd.f32 %v1651_v60, %v1613_v37  ;;  %v1693_v38 = vpop.f32.mrb[10].mxu1 }
 0x32b   :  { %v1694_v6 = vpop.f32.mrb[11].mxu1 }
 0x32c   :  { %v1558_v2 = vmul.f32 0.044715, %v1546_v57  ;;  %v1695_v16 = vadd.f32 %v1694_v6, %v1693_v38  ;;  %v1554_v49 = vmul.f32 0.7978846, %v1546_v57  ;;  %v1550_v4 = vmul.f32 0.5, %v1546_v57 }
 0x32d   :  { %v1652_v48 = vpop.f32.mrb[12].mxu0 }
 0x32e   :  { %v1562_v39 = vmul.f32 %v1558_v2, %v1546_v57  ;;  %v1533_v19 = vadd.f32 %v1695_v16, %v1448_v22  ;;  %v1653_v0 = vpop.f32.mrb[13].mxu0 }
 0x32f   :  { %v1654_v5 = vadd.f32 %v1653_v0, %v1652_v48 }
 0x330   :  { %v1566_v13 = vadd.f32 1.0, %v1562_v39  ;;  %v1547_v25 = vadd.f32 %v1914_v27, %v1533_v19 }
 0x331   :  { %v1453_v54 = vadd.f32 %v1654_v5, %v1613_v37 }
 0x332   :  { %v1559_v40 = vmul.f32 0.044715, %v1547_v25  ;;  %v1696_v12 = vpop.f32.mrb[12].mxu1  ;;  %v1570_v32 = vmul.f32 %v1566_v13, %v1554_v49  ;;  %v1555_v36 = vmul.f32 0.7978846, %v1547_v25  ;;  %v1551_v30 = vmul.f32 0.5, %v1547_v25 }
 0x333   :  { %v1697_v46 = vpop.f32.mrb[13].mxu1 }
 0x334   :  { %v1563_v43 = vmul.f32 %v1559_v40, %v1547_v25  ;;  %v1698_v28 = vadd.f32 %v1697_v46, %v1696_v12  ;;  %1905 = vtanh.f32 %v1570_v32 }
 0x336   :  { %v1567_v41 = vadd.f32 1.0, %v1563_v43  ;;  %v1538_v7 = vadd.f32 %v1698_v28, %v1453_v54 }
 0x338   :  { %v1571_v3 = vmul.f32 %v1567_v41, %v1555_v36  ;;  %v1548_v50 = vadd.f32 %v1915_v1, %v1538_v7 }
 0x339   :  { %v1655_v21 = vpop.f32.mrb[14].mxu0 }
 0x33a   :  { %1907 = vtanh.f32 %v1571_v3  ;;  %v1560_v20 = vmul.f32 0.044715, %v1548_v50  ;;  %v1656_v59 = vpop.f32.mrb[15].mxu0  ;;  %v1556_v17 = vmul.f32 0.7978846, %v1548_v50  ;;  %v1552_v18 = vmul.f32 0.5, %v1548_v50 }
 0x33b   :  { %v1657_v53 = vadd.f32 %v1656_v59, %v1655_v21 }
 0x33c   :  { %v1564_v63 = vmul.f32 %v1560_v20, %v1548_v50  ;;  %v1699_v61 = vpop.f32.mrb[14].mxu1 }
 0x33d   :  { %v1458_v23 = vadd.f32 %v1657_v53, %v1613_v37  ;;  %v1700_v14 = vpop.f32.mrb[15].mxu1 }
 0x33e   :  { %v1906_v8 = vpop.eup %1905  ;;  %v1568_v45 = vadd.f32 1.0, %v1564_v63  ;;  %v1701_v26 = vadd.f32 %v1700_v14, %v1699_v61 }
 0x33f   :  { %v1578_v34 = vadd.f32 1.0, %v1906_v8 }
 0x340   :  { %v1572_v35 = vmul.f32 %v1568_v45, %v1556_v17  ;;  %v1543_v9 = vadd.f32 %v1701_v26, %v1458_v23 }
 0x341   :  { %v1582_v11 = vmul.f32 %v1578_v34, %v1550_v4 }
 0x342   :  { %1909 = vtanh.f32 %v1572_v35  ;;  %v1549_v51 = vadd.f32 %v1916_v58, %v1543_v9 }
 0x343   :  { %1586 = vst [vmem:[#allocation10] sm:$0xff] %v1582_v11 }
 0x344   :  { %v1908_v24 = vpop.eup %1907  ;;  %v1561_v62 = vmul.f32 0.044715, %v1549_v51  ;;  %v1557_v52 = vmul.f32 0.7978846, %v1549_v51  ;;  %v1553_v42 = vmul.f32 0.5, %v1549_v51 }
 0x345   :  { %v1579_v10 = vadd.f32 1.0, %v1908_v24 }
 0x346   :  { %v1565_v15 = vmul.f32 %v1561_v62, %v1549_v51 }
 0x347   :  { %v1583_v47 = vmul.f32 %v1579_v10, %v1551_v30 }
 0x348   :  { %v1569_v31 = vadd.f32 1.0, %v1565_v15 }
 0x349   :  { %1587 = vst [vmem:[#allocation10 + $0x8] sm:$0xff] %v1583_v47 }
 0x34a   :  { %v1573_v37 = vmul.f32 %v1569_v31, %v1557_v52 }
 0x34c   :  { %v1910_v44 = vpop.eup %1909  ;;  %1911 = vtanh.f32 %v1573_v37 }
 0x34d   :  { %v1580_v29 = vadd.f32 1.0, %v1910_v44 }
 0x34f   :  { %v1584_v33 = vmul.f32 %v1580_v29, %v1552_v18 }
 0x351   :  { %1588 = vst [vmem:[#allocation10 + $0x10] sm:$0xff] %v1584_v33 }
 0x356   :  { %v1912_v55 = vpop.eup %1911 }
 0x357   :  { %v1581_v60 = vadd.f32 1.0, %v1912_v55 }
 0x359   :  { %v1585_v56 = vmul.f32 %v1581_v60, %v1553_v42 }
 0x35b   :  { %1589 = vst [vmem:[#allocation10 + $0x18] sm:$0xff] %v1585_v56 }
 0x35c   :  { %2016 = shalt.err (!%p2013_p8)
}
 0x35d   :  { %s2017_s15 = scalar_lea.hbm %s3476_s7, 512 }
 0x35e   :  { %p2018_p9 = scmp.ne.s32.totalorder %s3476_s7, %s2017_s15  ;;  %p2021_p10 = scmp.lt.u32.totalorder %s2017_s15, %s3476_s7 }
 0x360   :  { %p2023_p11 = pnand %p2021_p10, %p2018_p9 }
 0x362   :  { %2026 = shalt.err (!%p2023_p11)
}
 0x363   :  { %1601 = dma.vmem_to_hbm [thread:$0]  %s1596_s9, 512, %s3476_s7, [#allocation4], %s2039_s1, %s2039_s1, %s2040_s25  }
 0x364   :  { %2033 = dma.done.wait [#allocation4], 512  }
 0x365   :  { %2034 = vsyncadd [#allocation4], 4294966784 }
 0x366   :  { %1605 = vsyncpa [#allocation3], 1 }
 0x367   :  { %1606 = vsyncpa [#allocation6], 1 }
 0x368   :  { %1607 = vsyncpa [#allocation9], 1 }
 0x369   :  { %1608 = vsyncpa [#allocation4], 1 }

</bundles_post_ra>
